<compile_context>
chip_gen: v5e
topology: v5e:2x2
jax: 0.10.0
libtpu: 0.0.40
codegen_flags: <defaults>
</compile_context>

<pallas_src>
import functools
import jax
import jax.numpy as jnp
from jax.experimental import pallas as pl
from jax.experimental.pallas import tpu as pltpu

# ----------------- scaled-down "bert-base-uncased" config -----------------
VOCAB = 128
MAX_POS = 16
HIDDEN = 32
NUM_HEADS = 4
HEAD_DIM = HIDDEN // NUM_HEADS
NUM_LAYERS = 2
INTERMEDIATE = 64
NUM_LABELS = 3
LN_EPS = 1e-12
LANE = 128          # lane-dense padding width for the classifier output
NEG_INF = -1e9      # cross-batch attention block mask

_VMEM_SPEC = pl.BlockSpec(memory_space=pltpu.MemorySpace.VMEM)


# ----------------------------- kernel helpers ------------------------------
def _layernorm(x, g, b):
    mu = jnp.mean(x, axis=-1, keepdims=True)
    var = jnp.mean((x - mu) ** 2, axis=-1, keepdims=True)
    return (x - mu) * jax.lax.rsqrt(var + LN_EPS) * g + b


def _gelu(x):
    # TODO(synk): BERT uses exact erf-GELU; tanh-approx GELU used here (EUP-friendly).
    return 0.5 * x * (1.0 + jnp.tanh(0.7978845608028654 * (x + 0.044715 * x * x * x)))


# ------------------------------- fused kernel ------------------------------
def _bert_kernel(ids_ref, mask_ref,
                 wemb_ref, pemb_ref, temb_ref, emb_g_ref, emb_b_ref,
                 wqkv_ref, bqkv_ref, wo_ref, bo_ref,
                 ln1g_ref, ln1b_ref, wi_ref, bi_ref,
                 wout_ref, bout_ref, ln2g_ref, ln2b_ref,
                 wp_ref, bp_ref, wfc_ref, bfc_ref,
                 o_ref, *, batch, seq_len):
    """Embeddings + embedding-LN + all encoder layers + pooler + classifier.

    ids_ref:  (B*S, 1) int32 token ids.
    mask_ref: (B*S, B*S) f32 additive attention mask (block-diag + padding).
    Layer params are stacked along a leading NUM_LAYERS axis.
    o_ref:    (B, LANE) lane-dense logits slab (first NUM_LABELS cols valid).
    """
    BS = batch * seq_len
    scale = 1.0 / (HEAD_DIM ** 0.5)

    # ---- embedding lookup as a one-hot MXU matmul (avoids in-kernel gather) ----
    onehot = (jax.lax.broadcasted_iota(jnp.int32, (BS, VOCAB), 1)
              == ids_ref[...]).astype(jnp.float32)                     # (B*S, VOCAB)
    x = jnp.dot(onehot, wemb_ref[...], preferred_element_type=jnp.float32)
    postok = pemb_ref[:seq_len, :] + temb_ref[0:1, :]                  # (S, HIDDEN)
    x = x + jnp.concatenate([postok] * batch, axis=0)                  # (B*S, HIDDEN)
    x = _layernorm(x, emb_g_ref[...], emb_b_ref[...])

    addmask = mask_ref[...]                                            # (B*S, B*S)

    for l in range(NUM_LAYERS):                                        # static unroll
        # ---- fused QKV projection: one (HIDDEN, 3*HIDDEN) matmul ----
        qkv = jnp.dot(x, wqkv_ref[l], preferred_element_type=jnp.float32) + bqkv_ref[l]
        q = qkv[:, :HIDDEN] * scale                                    # scale folded into q
        k = qkv[:, HIDDEN:2 * HIDDEN]
        v = qkv[:, 2 * HIDDEN:]

        # ---- attention: all batches at once per head via block-diagonal mask ----
        head_ctx = []
        for h in range(NUM_HEADS):
            c0 = h * HEAD_DIM
            qh = q[:, c0:c0 + HEAD_DIM]                                # (B*S, Dh)
            kh = k[:, c0:c0 + HEAD_DIM]
            vh = v[:, c0:c0 + HEAD_DIM]
            s = jax.lax.dot_general(qh, kh, (((1,), (1,)), ((), ())),
                                    preferred_element_type=jnp.float32)  # (B*S, B*S)
            s = s + addmask
            s = s - jnp.max(s, axis=-1, keepdims=True)
            p = jnp.exp(s)
            p = p * pl.reciprocal(jnp.sum(p, axis=-1, keepdims=True), approx=True)
            head_ctx.append(jnp.dot(p, vh, preferred_element_type=jnp.float32))
        ctx = jnp.concatenate(head_ctx, axis=-1)                       # (B*S, HIDDEN)

        # ---- attention output projection + residual + LN ----
        attn_out = jnp.dot(ctx, wo_ref[l], preferred_element_type=jnp.float32) + bo_ref[l]
        x = _layernorm(attn_out + x, ln1g_ref[l], ln1b_ref[l])

        # ---- feed-forward + residual + LN ----
        ff = jnp.dot(x, wi_ref[l], preferred_element_type=jnp.float32) + bi_ref[l]
        ff = _gelu(ff)
        ff = jnp.dot(ff, wout_ref[l], preferred_element_type=jnp.float32) + bout_ref[l]
        x = _layernorm(ff + x, ln2g_ref[l], ln2b_ref[l])

    # ---- CLS extraction + pooler tanh(Linear) + classifier Linear ----
    cls = jnp.concatenate([x[b * seq_len:b * seq_len + 1, :] for b in range(batch)],
                          axis=0)                                      # (B, HIDDEN)
    pooled = jnp.tanh(jnp.dot(cls, wp_ref[...],
                              preferred_element_type=jnp.float32) + bp_ref[...])
    logits = jnp.dot(pooled, wfc_ref[...],
                     preferred_element_type=jnp.float32) + bfc_ref[...]  # (B, NUM_LABELS)
    o_ref[...] = jnp.concatenate(
        [logits, jnp.zeros((batch, LANE - NUM_LABELS), jnp.float32)], axis=-1)


# -------------------------- parameter construction -------------------------
def _dense_init(key, shape, std=0.02):
    return std * jax.random.normal(key, shape, dtype=jnp.float32)


def init_params(key):
    keys = iter(jax.random.split(key, 64))

    def dense(shape):
        return _dense_init(next(keys), shape)

    L = NUM_LAYERS
    enc = {
        "wqkv": jnp.stack([dense((HIDDEN, 3 * HIDDEN)) for _ in range(L)]),
        "bqkv": jnp.zeros((L, 1, 3 * HIDDEN), jnp.float32),
        "wo": jnp.stack([dense((HIDDEN, HIDDEN)) for _ in range(L)]),
        "bo": jnp.zeros((L, 1, HIDDEN), jnp.float32),
        "ln1_g": jnp.ones((L, 1, HIDDEN), jnp.float32),
        "ln1_b": jnp.zeros((L, 1, HIDDEN), jnp.float32),
        "wi": jnp.stack([dense((HIDDEN, INTERMEDIATE)) for _ in range(L)]),
        "bi": jnp.zeros((L, 1, INTERMEDIATE), jnp.float32),
        "wout": jnp.stack([dense((INTERMEDIATE, HIDDEN)) for _ in range(L)]),
        "bout": jnp.zeros((L, 1, HIDDEN), jnp.float32),
        "ln2_g": jnp.ones((L, 1, HIDDEN), jnp.float32),
        "ln2_b": jnp.zeros((L, 1, HIDDEN), jnp.float32),
    }
    return {
        "word_emb": dense((VOCAB, HIDDEN)),
        "pos_emb": dense((MAX_POS, HIDDEN)),
        "tok_emb": dense((2, HIDDEN)),
        "emb_ln_g": jnp.ones((1, HIDDEN), jnp.float32),
        "emb_ln_b": jnp.zeros((1, HIDDEN), jnp.float32),
        "enc": enc,
        "wp": dense((HIDDEN, HIDDEN)),
        "bp": jnp.zeros((1, HIDDEN), jnp.float32),
        "wfc": dense((HIDDEN, NUM_LABELS)),
        "bfc": jnp.zeros((1, NUM_LABELS), jnp.float32),
    }


# ------------------------------ forward pass -------------------------------
def bert_classifier_forward(params, input_ids, attention_mask):
    B, S = input_ids.shape
    BS = B * S

    ids = input_ids.astype(jnp.int32).reshape(BS, 1)

    # Block-diagonal additive attention mask over the flattened (B*S) token axis:
    #   cross-batch pairs -> -1e9 ; within-batch pairs -> BERT padding mask
    #   (0 for valid key tokens, -10000 for padding).
    key_pad = ((1.0 - attention_mask.astype(jnp.float32)) * -10000.0).reshape(1, BS)
    bid = jnp.repeat(jnp.arange(B, dtype=jnp.int32), S)
    same_batch = bid[:, None] == bid[None, :]                          # (B*S, B*S)
    addmask = jnp.where(same_batch, key_pad, NEG_INF).astype(jnp.float32)

    e = params["enc"]
    logits_pad = pl.pallas_call(
        functools.partial(_bert_kernel, batch=B, seq_len=S),
        out_shape=jax.ShapeDtypeStruct((B, LANE), jnp.float32),
        in_specs=[_VMEM_SPEC] * 23,
        out_specs=_VMEM_SPEC,
    )(ids, addmask,
      params["word_emb"], params["pos_emb"], params["tok_emb"],
      params["emb_ln_g"], params["emb_ln_b"],
      e["wqkv"], e["bqkv"], e["wo"], e["bo"],
      e["ln1_g"], e["ln1_b"], e["wi"], e["bi"],
      e["wout"], e["bout"], e["ln2_g"], e["ln2_b"],
      params["wp"], params["bp"], params["wfc"], params["bfc"])

    return logits_pad[:, :NUM_LABELS]


# ----------------------------------- main -----------------------------------
if __name__ == "__main__":
    key = jax.random.PRNGKey(0)
    k_param, k_ids = jax.random.split(key)

    B, S = 2, 8
    params = init_params(k_param)

    input_ids = jax.random.randint(k_ids, (B, S), 0, VOCAB, dtype=jnp.int32)
    attention_mask = jnp.array(
        [[1, 1, 1, 1, 1, 1, 1, 1],
         [1, 1, 1, 1, 1, 0, 0, 0]], dtype=jnp.int32)

    fwd = jax.jit(bert_classifier_forward)
    logits = jax.block_until_ready(fwd(params, input_ids, attention_mask))
    assert logits.shape == (B, NUM_LABELS)
    print("KERNEL_OK")
</pallas_src>

<mosaic_0001>
module attributes {stable_mosaic.version = 11 : i64} {
  func.func @_bert_kernel(%arg0: memref<16x1xi32, #tpu.memory_space<vmem>>, %arg1: memref<16x16xf32, #tpu.memory_space<vmem>>, %arg2: memref<128x32xf32, #tpu.memory_space<vmem>>, %arg3: memref<16x32xf32, #tpu.memory_space<vmem>>, %arg4: memref<2x32xf32, #tpu.memory_space<vmem>>, %arg5: memref<1x32xf32, #tpu.memory_space<vmem>>, %arg6: memref<1x32xf32, #tpu.memory_space<vmem>>, %arg7: memref<2x32x96xf32, #tpu.memory_space<vmem>>, %arg8: memref<2x1x96xf32, #tpu.memory_space<vmem>>, %arg9: memref<2x32x32xf32, #tpu.memory_space<vmem>>, %arg10: memref<2x1x32xf32, #tpu.memory_space<vmem>>, %arg11: memref<2x1x32xf32, #tpu.memory_space<vmem>>, %arg12: memref<2x1x32xf32, #tpu.memory_space<vmem>>, %arg13: memref<2x32x64xf32, #tpu.memory_space<vmem>>, %arg14: memref<2x1x64xf32, #tpu.memory_space<vmem>>, %arg15: memref<2x64x32xf32, #tpu.memory_space<vmem>>, %arg16: memref<2x1x32xf32, #tpu.memory_space<vmem>>, %arg17: memref<2x1x32xf32, #tpu.memory_space<vmem>>, %arg18: memref<2x1x32xf32, #tpu.memory_space<vmem>>, %arg19: memref<32x32xf32, #tpu.memory_space<vmem>>, %arg20: memref<1x32xf32, #tpu.memory_space<vmem>>, %arg21: memref<32x3xf32, #tpu.memory_space<vmem>>, %arg22: memref<1x3xf32, #tpu.memory_space<vmem>>, %arg23: memref<2x128xf32, #tpu.memory_space<vmem>>) attributes {dimension_semantics = [], scalar_prefetch = 0 : i64, scratch_operands = 0 : i64, tpu.core_type = #tpu.core_type<tc>} {
    %0 = tpu.iota {dimensions = array<i32: 1>} : vector<16x128xi32>
    %c0 = arith.constant 0 : index
    %c0_0 = arith.constant 0 : index
    %1 = vector.load %arg0[%c0, %c0_0] : memref<16x1xi32, #tpu.memory_space<vmem>>, vector<16x1xi32>
    %2 = vector.broadcast %1 : vector<16x1xi32> to vector<16x128xi32>
    %3 = arith.cmpi eq, %0, %2 : vector<16x128xi32>
    %4 = arith.extui %3 : vector<16x128xi1> to vector<16x128xi32>
    %5 = arith.sitofp %4 : vector<16x128xi32> to vector<16x128xf32>
    %c0_1 = arith.constant 0 : index
    %c0_2 = arith.constant 0 : index
    %6 = vector.load %arg2[%c0_1, %c0_2] : memref<128x32xf32, #tpu.memory_space<vmem>>, vector<128x32xf32>
    %cst = arith.constant dense<0.000000e+00> : vector<16x32xf32>
    %7 = tpu.matmul %5, %6, %cst {dimension_numbers = #tpu.dot_dimension_numbers<[1], [0], [0], [1], [0, 0, 1, 1], [], []>} : vector<16x128xf32>, vector<128x32xf32>, vector<16x32xf32> -> vector<16x32xf32>
    %c0_3 = arith.constant 0 : index
    %c0_4 = arith.constant 0 : index
    %8 = vector.load %arg3[%c0_3, %c0_4] : memref<16x32xf32, #tpu.memory_space<vmem>>, vector<8x32xf32>
    %c0_5 = arith.constant 0 : index
    %c0_6 = arith.constant 0 : index
    %9 = vector.load %arg4[%c0_5, %c0_6] : memref<2x32xf32, #tpu.memory_space<vmem>>, vector<1x32xf32>
    %10 = vector.broadcast %9 : vector<1x32xf32> to vector<8x32xf32>
    %11 = arith.addf %8, %10 : vector<8x32xf32>
    %12 = tpu.concatenate %11, %11 in 0 : vector<8x32xf32>, vector<8x32xf32> -> vector<16x32xf32>
    %13 = arith.addf %7, %12 : vector<16x32xf32>
    %c0_7 = arith.constant 0 : index
    %c0_8 = arith.constant 0 : index
    %14 = vector.load %arg5[%c0_7, %c0_8] : memref<1x32xf32, #tpu.memory_space<vmem>>, vector<1x32xf32>
    %c0_9 = arith.constant 0 : index
    %c0_10 = arith.constant 0 : index
    %15 = vector.load %arg6[%c0_9, %c0_10] : memref<1x32xf32, #tpu.memory_space<vmem>>, vector<1x32xf32>
    %cst_11 = arith.constant dense<0.000000e+00> : vector<16xf32>
    %16 = vector.multi_reduction <add>, %13, %cst_11 [1] : vector<16x32xf32> to vector<16xf32>
    %17 = vector.shape_cast %16 : vector<16xf32> to vector<16x1xf32>
    %cst_12 = arith.constant 3.200000e+01 : f32
    %18 = vector.broadcast %cst_12 : f32 to vector<16x1xf32>
    %19 = arith.divf %17, %18 : vector<16x1xf32>
    %20 = vector.broadcast %19 : vector<16x1xf32> to vector<16x32xf32>
    %21 = arith.subf %13, %20 : vector<16x32xf32>
    %22 = arith.mulf %21, %21 : vector<16x32xf32>
    %cst_13 = arith.constant dense<0.000000e+00> : vector<16xf32>
    %23 = vector.multi_reduction <add>, %22, %cst_13 [1] : vector<16x32xf32> to vector<16xf32>
    %24 = vector.shape_cast %23 : vector<16xf32> to vector<16x1xf32>
    %cst_14 = arith.constant 3.200000e+01 : f32
    %25 = vector.broadcast %cst_14 : f32 to vector<16x1xf32>
    %26 = arith.divf %24, %25 : vector<16x1xf32>
    %27 = vector.broadcast %19 : vector<16x1xf32> to vector<16x32xf32>
    %28 = arith.subf %13, %27 : vector<16x32xf32>
    %cst_15 = arith.constant 9.99999996E-13 : f32
    %29 = vector.broadcast %cst_15 : f32 to vector<16x1xf32>
    %30 = arith.addf %26, %29 : vector<16x1xf32>
    %31 = math.rsqrt %30 : vector<16x1xf32>
    %32 = vector.broadcast %31 : vector<16x1xf32> to vector<16x32xf32>
    %33 = arith.mulf %28, %32 : vector<16x32xf32>
    %34 = vector.broadcast %14 : vector<1x32xf32> to vector<16x32xf32>
    %35 = arith.mulf %33, %34 : vector<16x32xf32>
    %36 = vector.broadcast %15 : vector<1x32xf32> to vector<16x32xf32>
    %37 = arith.addf %35, %36 : vector<16x32xf32>
    %c0_16 = arith.constant 0 : index
    %c0_17 = arith.constant 0 : index
    %38 = vector.load %arg1[%c0_16, %c0_17] : memref<16x16xf32, #tpu.memory_space<vmem>>, vector<16x16xf32>
    %c0_18 = arith.constant 0 : index
    %c0_19 = arith.constant 0 : index
    %c0_20 = arith.constant 0 : index
    %39 = vector.load %arg7[%c0_18, %c0_19, %c0_20] : memref<2x32x96xf32, #tpu.memory_space<vmem>>, vector<1x32x96xf32>
    %40 = vector.shape_cast %39 : vector<1x32x96xf32> to vector<32x96xf32>
    %cst_21 = arith.constant dense<0.000000e+00> : vector<16x96xf32>
    %41 = tpu.matmul %37, %40, %cst_21 {dimension_numbers = #tpu.dot_dimension_numbers<[1], [0], [0], [1], [0, 0, 1, 1], [], []>} : vector<16x32xf32>, vector<32x96xf32>, vector<16x96xf32> -> vector<16x96xf32>
    %c0_22 = arith.constant 0 : index
    %c0_23 = arith.constant 0 : index
    %c0_24 = arith.constant 0 : index
    %42 = vector.load %arg8[%c0_22, %c0_23, %c0_24] : memref<2x1x96xf32, #tpu.memory_space<vmem>>, vector<1x1x96xf32>
    %43 = vector.shape_cast %42 : vector<1x1x96xf32> to vector<1x96xf32>
    %44 = vector.broadcast %43 : vector<1x96xf32> to vector<16x96xf32>
    %45 = arith.addf %41, %44 : vector<16x96xf32>
    %46 = vector.extract_strided_slice %45 {offsets = [0, 0], sizes = [16, 32], strides = [1, 1]} : vector<16x96xf32> to vector<16x32xf32>
    %cst_25 = arith.constant 0.353553385 : f32
    %47 = vector.broadcast %cst_25 : f32 to vector<16x32xf32>
    %48 = arith.mulf %46, %47 : vector<16x32xf32>
    %49 = vector.extract_strided_slice %45 {offsets = [0, 32], sizes = [16, 32], strides = [1, 1]} : vector<16x96xf32> to vector<16x32xf32>
    %50 = vector.extract_strided_slice %45 {offsets = [0, 64], sizes = [16, 32], strides = [1, 1]} : vector<16x96xf32> to vector<16x32xf32>
    %51 = vector.extract_strided_slice %48 {offsets = [0, 0], sizes = [16, 8], strides = [1, 1]} : vector<16x32xf32> to vector<16x8xf32>
    %52 = vector.extract_strided_slice %49 {offsets = [0, 0], sizes = [16, 8], strides = [1, 1]} : vector<16x32xf32> to vector<16x8xf32>
    %53 = vector.extract_strided_slice %50 {offsets = [0, 0], sizes = [16, 8], strides = [1, 1]} : vector<16x32xf32> to vector<16x8xf32>
    %cst_26 = arith.constant dense<0.000000e+00> : vector<16x16xf32>
    %54 = tpu.matmul %51, %52, %cst_26 {dimension_numbers = #tpu.dot_dimension_numbers<[1], [1], [0], [0], [0, 0, 1, 0], [], []>} : vector<16x8xf32>, vector<16x8xf32>, vector<16x16xf32> -> vector<16x16xf32>
    %55 = arith.addf %54, %38 : vector<16x16xf32>
    %cst_27 = arith.constant dense<0xFF800000> : vector<16xf32>
    %56 = vector.multi_reduction <maximumf>, %55, %cst_27 [1] : vector<16x16xf32> to vector<16xf32>
    %57 = vector.shape_cast %56 : vector<16xf32> to vector<16x1xf32>
    %58 = vector.broadcast %57 : vector<16x1xf32> to vector<16x16xf32>
    %59 = arith.subf %55, %58 : vector<16x16xf32>
    %60 = math.exp %59 : vector<16x16xf32>
    %cst_28 = arith.constant dense<0.000000e+00> : vector<16xf32>
    %61 = vector.multi_reduction <add>, %60, %cst_28 [1] : vector<16x16xf32> to vector<16xf32>
    %62 = vector.shape_cast %61 : vector<16xf32> to vector<16x1xf32>
    %63 = tpu.reciprocal %62 {approx = true} : vector<16x1xf32> -> vector<16x1xf32>
    %64 = vector.broadcast %63 : vector<16x1xf32> to vector<16x16xf32>
    %65 = arith.mulf %60, %64 : vector<16x16xf32>
    %cst_29 = arith.constant dense<0.000000e+00> : vector<16x8xf32>
    %66 = tpu.matmul %65, %53, %cst_29 {dimension_numbers = #tpu.dot_dimension_numbers<[1], [0], [0], [1], [0, 0, 1, 1], [], []>} : vector<16x16xf32>, vector<16x8xf32>, vector<16x8xf32> -> vector<16x8xf32>
    %67 = vector.extract_strided_slice %48 {offsets = [0, 8], sizes = [16, 8], strides = [1, 1]} : vector<16x32xf32> to vector<16x8xf32>
    %68 = vector.extract_strided_slice %49 {offsets = [0, 8], sizes = [16, 8], strides = [1, 1]} : vector<16x32xf32> to vector<16x8xf32>
    %69 = vector.extract_strided_slice %50 {offsets = [0, 8], sizes = [16, 8], strides = [1, 1]} : vector<16x32xf32> to vector<16x8xf32>
    %cst_30 = arith.constant dense<0.000000e+00> : vector<16x16xf32>
    %70 = tpu.matmul %67, %68, %cst_30 {dimension_numbers = #tpu.dot_dimension_numbers<[1], [1], [0], [0], [0, 0, 1, 0], [], []>} : vector<16x8xf32>, vector<16x8xf32>, vector<16x16xf32> -> vector<16x16xf32>
    %71 = arith.addf %70, %38 : vector<16x16xf32>
    %cst_31 = arith.constant dense<0xFF800000> : vector<16xf32>
    %72 = vector.multi_reduction <maximumf>, %71, %cst_31 [1] : vector<16x16xf32> to vector<16xf32>
    %73 = vector.shape_cast %72 : vector<16xf32> to vector<16x1xf32>
    %74 = vector.broadcast %73 : vector<16x1xf32> to vector<16x16xf32>
    %75 = arith.subf %71, %74 : vector<16x16xf32>
    %76 = math.exp %75 : vector<16x16xf32>
    %cst_32 = arith.constant dense<0.000000e+00> : vector<16xf32>
    %77 = vector.multi_reduction <add>, %76, %cst_32 [1] : vector<16x16xf32> to vector<16xf32>
    %78 = vector.shape_cast %77 : vector<16xf32> to vector<16x1xf32>
    %79 = tpu.reciprocal %78 {approx = true} : vector<16x1xf32> -> vector<16x1xf32>
    %80 = vector.broadcast %79 : vector<16x1xf32> to vector<16x16xf32>
    %81 = arith.mulf %76, %80 : vector<16x16xf32>
    %cst_33 = arith.constant dense<0.000000e+00> : vector<16x8xf32>
    %82 = tpu.matmul %81, %69, %cst_33 {dimension_numbers = #tpu.dot_dimension_numbers<[1], [0], [0], [1], [0, 0, 1, 1], [], []>} : vector<16x16xf32>, vector<16x8xf32>, vector<16x8xf32> -> vector<16x8xf32>
    %83 = vector.extract_strided_slice %48 {offsets = [0, 16], sizes = [16, 8], strides = [1, 1]} : vector<16x32xf32> to vector<16x8xf32>
    %84 = vector.extract_strided_slice %49 {offsets = [0, 16], sizes = [16, 8], strides = [1, 1]} : vector<16x32xf32> to vector<16x8xf32>
    %85 = vector.extract_strided_slice %50 {offsets = [0, 16], sizes = [16, 8], strides = [1, 1]} : vector<16x32xf32> to vector<16x8xf32>
    %cst_34 = arith.constant dense<0.000000e+00> : vector<16x16xf32>
    %86 = tpu.matmul %83, %84, %cst_34 {dimension_numbers = #tpu.dot_dimension_numbers<[1], [1], [0], [0], [0, 0, 1, 0], [], []>} : vector<16x8xf32>, vector<16x8xf32>, vector<16x16xf32> -> vector<16x16xf32>
    %87 = arith.addf %86, %38 : vector<16x16xf32>
    %cst_35 = arith.constant dense<0xFF800000> : vector<16xf32>
    %88 = vector.multi_reduction <maximumf>, %87, %cst_35 [1] : vector<16x16xf32> to vector<16xf32>
    %89 = vector.shape_cast %88 : vector<16xf32> to vector<16x1xf32>
    %90 = vector.broadcast %89 : vector<16x1xf32> to vector<16x16xf32>
    %91 = arith.subf %87, %90 : vector<16x16xf32>
    %92 = math.exp %91 : vector<16x16xf32>
    %cst_36 = arith.constant dense<0.000000e+00> : vector<16xf32>
    %93 = vector.multi_reduction <add>, %92, %cst_36 [1] : vector<16x16xf32> to vector<16xf32>
    %94 = vector.shape_cast %93 : vector<16xf32> to vector<16x1xf32>
    %95 = tpu.reciprocal %94 {approx = true} : vector<16x1xf32> -> vector<16x1xf32>
    %96 = vector.broadcast %95 : vector<16x1xf32> to vector<16x16xf32>
    %97 = arith.mulf %92, %96 : vector<16x16xf32>
    %cst_37 = arith.constant dense<0.000000e+00> : vector<16x8xf32>
    %98 = tpu.matmul %97, %85, %cst_37 {dimension_numbers = #tpu.dot_dimension_numbers<[1], [0], [0], [1], [0, 0, 1, 1], [], []>} : vector<16x16xf32>, vector<16x8xf32>, vector<16x8xf32> -> vector<16x8xf32>
    %99 = vector.extract_strided_slice %48 {offsets = [0, 24], sizes = [16, 8], strides = [1, 1]} : vector<16x32xf32> to vector<16x8xf32>
    %100 = vector.extract_strided_slice %49 {offsets = [0, 24], sizes = [16, 8], strides = [1, 1]} : vector<16x32xf32> to vector<16x8xf32>
    %101 = vector.extract_strided_slice %50 {offsets = [0, 24], sizes = [16, 8], strides = [1, 1]} : vector<16x32xf32> to vector<16x8xf32>
    %cst_38 = arith.constant dense<0.000000e+00> : vector<16x16xf32>
    %102 = tpu.matmul %99, %100, %cst_38 {dimension_numbers = #tpu.dot_dimension_numbers<[1], [1], [0], [0], [0, 0, 1, 0], [], []>} : vector<16x8xf32>, vector<16x8xf32>, vector<16x16xf32> -> vector<16x16xf32>
    %103 = arith.addf %102, %38 : vector<16x16xf32>
    %cst_39 = arith.constant dense<0xFF800000> : vector<16xf32>
    %104 = vector.multi_reduction <maximumf>, %103, %cst_39 [1] : vector<16x16xf32> to vector<16xf32>
    %105 = vector.shape_cast %104 : vector<16xf32> to vector<16x1xf32>
    %106 = vector.broadcast %105 : vector<16x1xf32> to vector<16x16xf32>
    %107 = arith.subf %103, %106 : vector<16x16xf32>
    %108 = math.exp %107 : vector<16x16xf32>
    %cst_40 = arith.constant dense<0.000000e+00> : vector<16xf32>
    %109 = vector.multi_reduction <add>, %108, %cst_40 [1] : vector<16x16xf32> to vector<16xf32>
    %110 = vector.shape_cast %109 : vector<16xf32> to vector<16x1xf32>
    %111 = tpu.reciprocal %110 {approx = true} : vector<16x1xf32> -> vector<16x1xf32>
    %112 = vector.broadcast %111 : vector<16x1xf32> to vector<16x16xf32>
    %113 = arith.mulf %108, %112 : vector<16x16xf32>
    %cst_41 = arith.constant dense<0.000000e+00> : vector<16x8xf32>
    %114 = tpu.matmul %113, %101, %cst_41 {dimension_numbers = #tpu.dot_dimension_numbers<[1], [0], [0], [1], [0, 0, 1, 1], [], []>} : vector<16x16xf32>, vector<16x8xf32>, vector<16x8xf32> -> vector<16x8xf32>
    %115 = tpu.concatenate %66, %82, %98, %114 in 1 : vector<16x8xf32>, vector<16x8xf32>, vector<16x8xf32>, vector<16x8xf32> -> vector<16x32xf32>
    %c0_42 = arith.constant 0 : index
    %c0_43 = arith.constant 0 : index
    %c0_44 = arith.constant 0 : index
    %116 = vector.load %arg9[%c0_42, %c0_43, %c0_44] : memref<2x32x32xf32, #tpu.memory_space<vmem>>, vector<1x32x32xf32>
    %117 = vector.shape_cast %116 : vector<1x32x32xf32> to vector<32x32xf32>
    %cst_45 = arith.constant dense<0.000000e+00> : vector<16x32xf32>
    %118 = tpu.matmul %115, %117, %cst_45 {dimension_numbers = #tpu.dot_dimension_numbers<[1], [0], [0], [1], [0, 0, 1, 1], [], []>} : vector<16x32xf32>, vector<32x32xf32>, vector<16x32xf32> -> vector<16x32xf32>
    %c0_46 = arith.constant 0 : index
    %c0_47 = arith.constant 0 : index
    %c0_48 = arith.constant 0 : index
    %119 = vector.load %arg10[%c0_46, %c0_47, %c0_48] : memref<2x1x32xf32, #tpu.memory_space<vmem>>, vector<1x1x32xf32>
    %120 = vector.shape_cast %119 : vector<1x1x32xf32> to vector<1x32xf32>
    %121 = vector.broadcast %120 : vector<1x32xf32> to vector<16x32xf32>
    %122 = arith.addf %118, %121 : vector<16x32xf32>
    %123 = arith.addf %122, %37 : vector<16x32xf32>
    %c0_49 = arith.constant 0 : index
    %c0_50 = arith.constant 0 : index
    %c0_51 = arith.constant 0 : index
    %124 = vector.load %arg11[%c0_49, %c0_50, %c0_51] : memref<2x1x32xf32, #tpu.memory_space<vmem>>, vector<1x1x32xf32>
    %125 = vector.shape_cast %124 : vector<1x1x32xf32> to vector<1x32xf32>
    %c0_52 = arith.constant 0 : index
    %c0_53 = arith.constant 0 : index
    %c0_54 = arith.constant 0 : index
    %126 = vector.load %arg12[%c0_52, %c0_53, %c0_54] : memref<2x1x32xf32, #tpu.memory_space<vmem>>, vector<1x1x32xf32>
    %127 = vector.shape_cast %126 : vector<1x1x32xf32> to vector<1x32xf32>
    %cst_55 = arith.constant dense<0.000000e+00> : vector<16xf32>
    %128 = vector.multi_reduction <add>, %123, %cst_55 [1] : vector<16x32xf32> to vector<16xf32>
    %129 = vector.shape_cast %128 : vector<16xf32> to vector<16x1xf32>
    %cst_56 = arith.constant 3.200000e+01 : f32
    %130 = vector.broadcast %cst_56 : f32 to vector<16x1xf32>
    %131 = arith.divf %129, %130 : vector<16x1xf32>
    %132 = vector.broadcast %131 : vector<16x1xf32> to vector<16x32xf32>
    %133 = arith.subf %123, %132 : vector<16x32xf32>
    %134 = arith.mulf %133, %133 : vector<16x32xf32>
    %cst_57 = arith.constant dense<0.000000e+00> : vector<16xf32>
    %135 = vector.multi_reduction <add>, %134, %cst_57 [1] : vector<16x32xf32> to vector<16xf32>
    %136 = vector.shape_cast %135 : vector<16xf32> to vector<16x1xf32>
    %cst_58 = arith.constant 3.200000e+01 : f32
    %137 = vector.broadcast %cst_58 : f32 to vector<16x1xf32>
    %138 = arith.divf %136, %137 : vector<16x1xf32>
    %139 = vector.broadcast %131 : vector<16x1xf32> to vector<16x32xf32>
    %140 = arith.subf %123, %139 : vector<16x32xf32>
    %cst_59 = arith.constant 9.99999996E-13 : f32
    %141 = vector.broadcast %cst_59 : f32 to vector<16x1xf32>
    %142 = arith.addf %138, %141 : vector<16x1xf32>
    %143 = math.rsqrt %142 : vector<16x1xf32>
    %144 = vector.broadcast %143 : vector<16x1xf32> to vector<16x32xf32>
    %145 = arith.mulf %140, %144 : vector<16x32xf32>
    %146 = vector.broadcast %125 : vector<1x32xf32> to vector<16x32xf32>
    %147 = arith.mulf %145, %146 : vector<16x32xf32>
    %148 = vector.broadcast %127 : vector<1x32xf32> to vector<16x32xf32>
    %149 = arith.addf %147, %148 : vector<16x32xf32>
    %c0_60 = arith.constant 0 : index
    %c0_61 = arith.constant 0 : index
    %c0_62 = arith.constant 0 : index
    %150 = vector.load %arg13[%c0_60, %c0_61, %c0_62] : memref<2x32x64xf32, #tpu.memory_space<vmem>>, vector<1x32x64xf32>
    %151 = vector.shape_cast %150 : vector<1x32x64xf32> to vector<32x64xf32>
    %cst_63 = arith.constant dense<0.000000e+00> : vector<16x64xf32>
    %152 = tpu.matmul %149, %151, %cst_63 {dimension_numbers = #tpu.dot_dimension_numbers<[1], [0], [0], [1], [0, 0, 1, 1], [], []>} : vector<16x32xf32>, vector<32x64xf32>, vector<16x64xf32> -> vector<16x64xf32>
    %c0_64 = arith.constant 0 : index
    %c0_65 = arith.constant 0 : index
    %c0_66 = arith.constant 0 : index
    %153 = vector.load %arg14[%c0_64, %c0_65, %c0_66] : memref<2x1x64xf32, #tpu.memory_space<vmem>>, vector<1x1x64xf32>
    %154 = vector.shape_cast %153 : vector<1x1x64xf32> to vector<1x64xf32>
    %155 = vector.broadcast %154 : vector<1x64xf32> to vector<16x64xf32>
    %156 = arith.addf %152, %155 : vector<16x64xf32>
    %cst_67 = arith.constant 5.000000e-01 : f32
    %157 = vector.broadcast %cst_67 : f32 to vector<16x64xf32>
    %158 = arith.mulf %157, %156 : vector<16x64xf32>
    %cst_68 = arith.constant 4.471500e-02 : f32
    %159 = vector.broadcast %cst_68 : f32 to vector<16x64xf32>
    %160 = arith.mulf %159, %156 : vector<16x64xf32>
    %161 = arith.mulf %160, %156 : vector<16x64xf32>
    %162 = arith.mulf %161, %156 : vector<16x64xf32>
    %163 = arith.addf %156, %162 : vector<16x64xf32>
    %cst_69 = arith.constant 0.797884583 : f32
    %164 = vector.broadcast %cst_69 : f32 to vector<16x64xf32>
    %165 = arith.mulf %164, %163 : vector<16x64xf32>
    %166 = math.tanh %165 : vector<16x64xf32>
    %cst_70 = arith.constant 1.000000e+00 : f32
    %167 = vector.broadcast %cst_70 : f32 to vector<16x64xf32>
    %168 = arith.addf %167, %166 : vector<16x64xf32>
    %169 = arith.mulf %158, %168 : vector<16x64xf32>
    %c0_71 = arith.constant 0 : index
    %c0_72 = arith.constant 0 : index
    %c0_73 = arith.constant 0 : index
    %170 = vector.load %arg15[%c0_71, %c0_72, %c0_73] : memref<2x64x32xf32, #tpu.memory_space<vmem>>, vector<1x64x32xf32>
    %171 = vector.shape_cast %170 : vector<1x64x32xf32> to vector<64x32xf32>
    %cst_74 = arith.constant dense<0.000000e+00> : vector<16x32xf32>
    %172 = tpu.matmul %169, %171, %cst_74 {dimension_numbers = #tpu.dot_dimension_numbers<[1], [0], [0], [1], [0, 0, 1, 1], [], []>} : vector<16x64xf32>, vector<64x32xf32>, vector<16x32xf32> -> vector<16x32xf32>
    %c0_75 = arith.constant 0 : index
    %c0_76 = arith.constant 0 : index
    %c0_77 = arith.constant 0 : index
    %173 = vector.load %arg16[%c0_75, %c0_76, %c0_77] : memref<2x1x32xf32, #tpu.memory_space<vmem>>, vector<1x1x32xf32>
    %174 = vector.shape_cast %173 : vector<1x1x32xf32> to vector<1x32xf32>
    %175 = vector.broadcast %174 : vector<1x32xf32> to vector<16x32xf32>
    %176 = arith.addf %172, %175 : vector<16x32xf32>
    %177 = arith.addf %176, %149 : vector<16x32xf32>
    %c0_78 = arith.constant 0 : index
    %c0_79 = arith.constant 0 : index
    %c0_80 = arith.constant 0 : index
    %178 = vector.load %arg17[%c0_78, %c0_79, %c0_80] : memref<2x1x32xf32, #tpu.memory_space<vmem>>, vector<1x1x32xf32>
    %179 = vector.shape_cast %178 : vector<1x1x32xf32> to vector<1x32xf32>
    %c0_81 = arith.constant 0 : index
    %c0_82 = arith.constant 0 : index
    %c0_83 = arith.constant 0 : index
    %180 = vector.load %arg18[%c0_81, %c0_82, %c0_83] : memref<2x1x32xf32, #tpu.memory_space<vmem>>, vector<1x1x32xf32>
    %181 = vector.shape_cast %180 : vector<1x1x32xf32> to vector<1x32xf32>
    %cst_84 = arith.constant dense<0.000000e+00> : vector<16xf32>
    %182 = vector.multi_reduction <add>, %177, %cst_84 [1] : vector<16x32xf32> to vector<16xf32>
    %183 = vector.shape_cast %182 : vector<16xf32> to vector<16x1xf32>
    %cst_85 = arith.constant 3.200000e+01 : f32
    %184 = vector.broadcast %cst_85 : f32 to vector<16x1xf32>
    %185 = arith.divf %183, %184 : vector<16x1xf32>
    %186 = vector.broadcast %185 : vector<16x1xf32> to vector<16x32xf32>
    %187 = arith.subf %177, %186 : vector<16x32xf32>
    %188 = arith.mulf %187, %187 : vector<16x32xf32>
    %cst_86 = arith.constant dense<0.000000e+00> : vector<16xf32>
    %189 = vector.multi_reduction <add>, %188, %cst_86 [1] : vector<16x32xf32> to vector<16xf32>
    %190 = vector.shape_cast %189 : vector<16xf32> to vector<16x1xf32>
    %cst_87 = arith.constant 3.200000e+01 : f32
    %191 = vector.broadcast %cst_87 : f32 to vector<16x1xf32>
    %192 = arith.divf %190, %191 : vector<16x1xf32>
    %193 = vector.broadcast %185 : vector<16x1xf32> to vector<16x32xf32>
    %194 = arith.subf %177, %193 : vector<16x32xf32>
    %cst_88 = arith.constant 9.99999996E-13 : f32
    %195 = vector.broadcast %cst_88 : f32 to vector<16x1xf32>
    %196 = arith.addf %192, %195 : vector<16x1xf32>
    %197 = math.rsqrt %196 : vector<16x1xf32>
    %198 = vector.broadcast %197 : vector<16x1xf32> to vector<16x32xf32>
    %199 = arith.mulf %194, %198 : vector<16x32xf32>
    %200 = vector.broadcast %179 : vector<1x32xf32> to vector<16x32xf32>
    %201 = arith.mulf %199, %200 : vector<16x32xf32>
    %202 = vector.broadcast %181 : vector<1x32xf32> to vector<16x32xf32>
    %203 = arith.addf %201, %202 : vector<16x32xf32>
    %c1 = arith.constant 1 : index
    %c0_89 = arith.constant 0 : index
    %c0_90 = arith.constant 0 : index
    %204 = vector.load %arg7[%c1, %c0_89, %c0_90] : memref<2x32x96xf32, #tpu.memory_space<vmem>>, vector<1x32x96xf32>
    %205 = vector.shape_cast %204 : vector<1x32x96xf32> to vector<32x96xf32>
    %cst_91 = arith.constant dense<0.000000e+00> : vector<16x96xf32>
    %206 = tpu.matmul %203, %205, %cst_91 {dimension_numbers = #tpu.dot_dimension_numbers<[1], [0], [0], [1], [0, 0, 1, 1], [], []>} : vector<16x32xf32>, vector<32x96xf32>, vector<16x96xf32> -> vector<16x96xf32>
    %c1_92 = arith.constant 1 : index
    %c0_93 = arith.constant 0 : index
    %c0_94 = arith.constant 0 : index
    %207 = vector.load %arg8[%c1_92, %c0_93, %c0_94] : memref<2x1x96xf32, #tpu.memory_space<vmem>>, vector<1x1x96xf32>
    %208 = vector.shape_cast %207 : vector<1x1x96xf32> to vector<1x96xf32>
    %209 = vector.broadcast %208 : vector<1x96xf32> to vector<16x96xf32>
    %210 = arith.addf %206, %209 : vector<16x96xf32>
    %211 = vector.extract_strided_slice %210 {offsets = [0, 0], sizes = [16, 32], strides = [1, 1]} : vector<16x96xf32> to vector<16x32xf32>
    %cst_95 = arith.constant 0.353553385 : f32
    %212 = vector.broadcast %cst_95 : f32 to vector<16x32xf32>
    %213 = arith.mulf %211, %212 : vector<16x32xf32>
    %214 = vector.extract_strided_slice %210 {offsets = [0, 32], sizes = [16, 32], strides = [1, 1]} : vector<16x96xf32> to vector<16x32xf32>
    %215 = vector.extract_strided_slice %210 {offsets = [0, 64], sizes = [16, 32], strides = [1, 1]} : vector<16x96xf32> to vector<16x32xf32>
    %216 = vector.extract_strided_slice %213 {offsets = [0, 0], sizes = [16, 8], strides = [1, 1]} : vector<16x32xf32> to vector<16x8xf32>
    %217 = vector.extract_strided_slice %214 {offsets = [0, 0], sizes = [16, 8], strides = [1, 1]} : vector<16x32xf32> to vector<16x8xf32>
    %218 = vector.extract_strided_slice %215 {offsets = [0, 0], sizes = [16, 8], strides = [1, 1]} : vector<16x32xf32> to vector<16x8xf32>
    %cst_96 = arith.constant dense<0.000000e+00> : vector<16x16xf32>
    %219 = tpu.matmul %216, %217, %cst_96 {dimension_numbers = #tpu.dot_dimension_numbers<[1], [1], [0], [0], [0, 0, 1, 0], [], []>} : vector<16x8xf32>, vector<16x8xf32>, vector<16x16xf32> -> vector<16x16xf32>
    %220 = arith.addf %219, %38 : vector<16x16xf32>
    %cst_97 = arith.constant dense<0xFF800000> : vector<16xf32>
    %221 = vector.multi_reduction <maximumf>, %220, %cst_97 [1] : vector<16x16xf32> to vector<16xf32>
    %222 = vector.shape_cast %221 : vector<16xf32> to vector<16x1xf32>
    %223 = vector.broadcast %222 : vector<16x1xf32> to vector<16x16xf32>
    %224 = arith.subf %220, %223 : vector<16x16xf32>
    %225 = math.exp %224 : vector<16x16xf32>
    %cst_98 = arith.constant dense<0.000000e+00> : vector<16xf32>
    %226 = vector.multi_reduction <add>, %225, %cst_98 [1] : vector<16x16xf32> to vector<16xf32>
    %227 = vector.shape_cast %226 : vector<16xf32> to vector<16x1xf32>
    %228 = tpu.reciprocal %227 {approx = true} : vector<16x1xf32> -> vector<16x1xf32>
    %229 = vector.broadcast %228 : vector<16x1xf32> to vector<16x16xf32>
    %230 = arith.mulf %225, %229 : vector<16x16xf32>
    %cst_99 = arith.constant dense<0.000000e+00> : vector<16x8xf32>
    %231 = tpu.matmul %230, %218, %cst_99 {dimension_numbers = #tpu.dot_dimension_numbers<[1], [0], [0], [1], [0, 0, 1, 1], [], []>} : vector<16x16xf32>, vector<16x8xf32>, vector<16x8xf32> -> vector<16x8xf32>
    %232 = vector.extract_strided_slice %213 {offsets = [0, 8], sizes = [16, 8], strides = [1, 1]} : vector<16x32xf32> to vector<16x8xf32>
    %233 = vector.extract_strided_slice %214 {offsets = [0, 8], sizes = [16, 8], strides = [1, 1]} : vector<16x32xf32> to vector<16x8xf32>
    %234 = vector.extract_strided_slice %215 {offsets = [0, 8], sizes = [16, 8], strides = [1, 1]} : vector<16x32xf32> to vector<16x8xf32>
    %cst_100 = arith.constant dense<0.000000e+00> : vector<16x16xf32>
    %235 = tpu.matmul %232, %233, %cst_100 {dimension_numbers = #tpu.dot_dimension_numbers<[1], [1], [0], [0], [0, 0, 1, 0], [], []>} : vector<16x8xf32>, vector<16x8xf32>, vector<16x16xf32> -> vector<16x16xf32>
    %236 = arith.addf %235, %38 : vector<16x16xf32>
    %cst_101 = arith.constant dense<0xFF800000> : vector<16xf32>
    %237 = vector.multi_reduction <maximumf>, %236, %cst_101 [1] : vector<16x16xf32> to vector<16xf32>
    %238 = vector.shape_cast %237 : vector<16xf32> to vector<16x1xf32>
    %239 = vector.broadcast %238 : vector<16x1xf32> to vector<16x16xf32>
    %240 = arith.subf %236, %239 : vector<16x16xf32>
    %241 = math.exp %240 : vector<16x16xf32>
    %cst_102 = arith.constant dense<0.000000e+00> : vector<16xf32>
    %242 = vector.multi_reduction <add>, %241, %cst_102 [1] : vector<16x16xf32> to vector<16xf32>
    %243 = vector.shape_cast %242 : vector<16xf32> to vector<16x1xf32>
    %244 = tpu.reciprocal %243 {approx = true} : vector<16x1xf32> -> vector<16x1xf32>
    %245 = vector.broadcast %244 : vector<16x1xf32> to vector<16x16xf32>
    %246 = arith.mulf %241, %245 : vector<16x16xf32>
    %cst_103 = arith.constant dense<0.000000e+00> : vector<16x8xf32>
    %247 = tpu.matmul %246, %234, %cst_103 {dimension_numbers = #tpu.dot_dimension_numbers<[1], [0], [0], [1], [0, 0, 1, 1], [], []>} : vector<16x16xf32>, vector<16x8xf32>, vector<16x8xf32> -> vector<16x8xf32>
    %248 = vector.extract_strided_slice %213 {offsets = [0, 16], sizes = [16, 8], strides = [1, 1]} : vector<16x32xf32> to vector<16x8xf32>
    %249 = vector.extract_strided_slice %214 {offsets = [0, 16], sizes = [16, 8], strides = [1, 1]} : vector<16x32xf32> to vector<16x8xf32>
    %250 = vector.extract_strided_slice %215 {offsets = [0, 16], sizes = [16, 8], strides = [1, 1]} : vector<16x32xf32> to vector<16x8xf32>
    %cst_104 = arith.constant dense<0.000000e+00> : vector<16x16xf32>
    %251 = tpu.matmul %248, %249, %cst_104 {dimension_numbers = #tpu.dot_dimension_numbers<[1], [1], [0], [0], [0, 0, 1, 0], [], []>} : vector<16x8xf32>, vector<16x8xf32>, vector<16x16xf32> -> vector<16x16xf32>
    %252 = arith.addf %251, %38 : vector<16x16xf32>
    %cst_105 = arith.constant dense<0xFF800000> : vector<16xf32>
    %253 = vector.multi_reduction <maximumf>, %252, %cst_105 [1] : vector<16x16xf32> to vector<16xf32>
    %254 = vector.shape_cast %253 : vector<16xf32> to vector<16x1xf32>
    %255 = vector.broadcast %254 : vector<16x1xf32> to vector<16x16xf32>
    %256 = arith.subf %252, %255 : vector<16x16xf32>
    %257 = math.exp %256 : vector<16x16xf32>
    %cst_106 = arith.constant dense<0.000000e+00> : vector<16xf32>
    %258 = vector.multi_reduction <add>, %257, %cst_106 [1] : vector<16x16xf32> to vector<16xf32>
    %259 = vector.shape_cast %258 : vector<16xf32> to vector<16x1xf32>
    %260 = tpu.reciprocal %259 {approx = true} : vector<16x1xf32> -> vector<16x1xf32>
    %261 = vector.broadcast %260 : vector<16x1xf32> to vector<16x16xf32>
    %262 = arith.mulf %257, %261 : vector<16x16xf32>
    %cst_107 = arith.constant dense<0.000000e+00> : vector<16x8xf32>
    %263 = tpu.matmul %262, %250, %cst_107 {dimension_numbers = #tpu.dot_dimension_numbers<[1], [0], [0], [1], [0, 0, 1, 1], [], []>} : vector<16x16xf32>, vector<16x8xf32>, vector<16x8xf32> -> vector<16x8xf32>
    %264 = vector.extract_strided_slice %213 {offsets = [0, 24], sizes = [16, 8], strides = [1, 1]} : vector<16x32xf32> to vector<16x8xf32>
    %265 = vector.extract_strided_slice %214 {offsets = [0, 24], sizes = [16, 8], strides = [1, 1]} : vector<16x32xf32> to vector<16x8xf32>
    %266 = vector.extract_strided_slice %215 {offsets = [0, 24], sizes = [16, 8], strides = [1, 1]} : vector<16x32xf32> to vector<16x8xf32>
    %cst_108 = arith.constant dense<0.000000e+00> : vector<16x16xf32>
    %267 = tpu.matmul %264, %265, %cst_108 {dimension_numbers = #tpu.dot_dimension_numbers<[1], [1], [0], [0], [0, 0, 1, 0], [], []>} : vector<16x8xf32>, vector<16x8xf32>, vector<16x16xf32> -> vector<16x16xf32>
    %268 = arith.addf %267, %38 : vector<16x16xf32>
    %cst_109 = arith.constant dense<0xFF800000> : vector<16xf32>
    %269 = vector.multi_reduction <maximumf>, %268, %cst_109 [1] : vector<16x16xf32> to vector<16xf32>
    %270 = vector.shape_cast %269 : vector<16xf32> to vector<16x1xf32>
    %271 = vector.broadcast %270 : vector<16x1xf32> to vector<16x16xf32>
    %272 = arith.subf %268, %271 : vector<16x16xf32>
    %273 = math.exp %272 : vector<16x16xf32>
    %cst_110 = arith.constant dense<0.000000e+00> : vector<16xf32>
    %274 = vector.multi_reduction <add>, %273, %cst_110 [1] : vector<16x16xf32> to vector<16xf32>
    %275 = vector.shape_cast %274 : vector<16xf32> to vector<16x1xf32>
    %276 = tpu.reciprocal %275 {approx = true} : vector<16x1xf32> -> vector<16x1xf32>
    %277 = vector.broadcast %276 : vector<16x1xf32> to vector<16x16xf32>
    %278 = arith.mulf %273, %277 : vector<16x16xf32>
    %cst_111 = arith.constant dense<0.000000e+00> : vector<16x8xf32>
    %279 = tpu.matmul %278, %266, %cst_111 {dimension_numbers = #tpu.dot_dimension_numbers<[1], [0], [0], [1], [0, 0, 1, 1], [], []>} : vector<16x16xf32>, vector<16x8xf32>, vector<16x8xf32> -> vector<16x8xf32>
    %280 = tpu.concatenate %231, %247, %263, %279 in 1 : vector<16x8xf32>, vector<16x8xf32>, vector<16x8xf32>, vector<16x8xf32> -> vector<16x32xf32>
    %c1_112 = arith.constant 1 : index
    %c0_113 = arith.constant 0 : index
    %c0_114 = arith.constant 0 : index
    %281 = vector.load %arg9[%c1_112, %c0_113, %c0_114] : memref<2x32x32xf32, #tpu.memory_space<vmem>>, vector<1x32x32xf32>
    %282 = vector.shape_cast %281 : vector<1x32x32xf32> to vector<32x32xf32>
    %cst_115 = arith.constant dense<0.000000e+00> : vector<16x32xf32>
    %283 = tpu.matmul %280, %282, %cst_115 {dimension_numbers = #tpu.dot_dimension_numbers<[1], [0], [0], [1], [0, 0, 1, 1], [], []>} : vector<16x32xf32>, vector<32x32xf32>, vector<16x32xf32> -> vector<16x32xf32>
    %c1_116 = arith.constant 1 : index
    %c0_117 = arith.constant 0 : index
    %c0_118 = arith.constant 0 : index
    %284 = vector.load %arg10[%c1_116, %c0_117, %c0_118] : memref<2x1x32xf32, #tpu.memory_space<vmem>>, vector<1x1x32xf32>
    %285 = vector.shape_cast %284 : vector<1x1x32xf32> to vector<1x32xf32>
    %286 = vector.broadcast %285 : vector<1x32xf32> to vector<16x32xf32>
    %287 = arith.addf %283, %286 : vector<16x32xf32>
    %288 = arith.addf %287, %203 : vector<16x32xf32>
    %c1_119 = arith.constant 1 : index
    %c0_120 = arith.constant 0 : index
    %c0_121 = arith.constant 0 : index
    %289 = vector.load %arg11[%c1_119, %c0_120, %c0_121] : memref<2x1x32xf32, #tpu.memory_space<vmem>>, vector<1x1x32xf32>
    %290 = vector.shape_cast %289 : vector<1x1x32xf32> to vector<1x32xf32>
    %c1_122 = arith.constant 1 : index
    %c0_123 = arith.constant 0 : index
    %c0_124 = arith.constant 0 : index
    %291 = vector.load %arg12[%c1_122, %c0_123, %c0_124] : memref<2x1x32xf32, #tpu.memory_space<vmem>>, vector<1x1x32xf32>
    %292 = vector.shape_cast %291 : vector<1x1x32xf32> to vector<1x32xf32>
    %cst_125 = arith.constant dense<0.000000e+00> : vector<16xf32>
    %293 = vector.multi_reduction <add>, %288, %cst_125 [1] : vector<16x32xf32> to vector<16xf32>
    %294 = vector.shape_cast %293 : vector<16xf32> to vector<16x1xf32>
    %cst_126 = arith.constant 3.200000e+01 : f32
    %295 = vector.broadcast %cst_126 : f32 to vector<16x1xf32>
    %296 = arith.divf %294, %295 : vector<16x1xf32>
    %297 = vector.broadcast %296 : vector<16x1xf32> to vector<16x32xf32>
    %298 = arith.subf %288, %297 : vector<16x32xf32>
    %299 = arith.mulf %298, %298 : vector<16x32xf32>
    %cst_127 = arith.constant dense<0.000000e+00> : vector<16xf32>
    %300 = vector.multi_reduction <add>, %299, %cst_127 [1] : vector<16x32xf32> to vector<16xf32>
    %301 = vector.shape_cast %300 : vector<16xf32> to vector<16x1xf32>
    %cst_128 = arith.constant 3.200000e+01 : f32
    %302 = vector.broadcast %cst_128 : f32 to vector<16x1xf32>
    %303 = arith.divf %301, %302 : vector<16x1xf32>
    %304 = vector.broadcast %296 : vector<16x1xf32> to vector<16x32xf32>
    %305 = arith.subf %288, %304 : vector<16x32xf32>
    %cst_129 = arith.constant 9.99999996E-13 : f32
    %306 = vector.broadcast %cst_129 : f32 to vector<16x1xf32>
    %307 = arith.addf %303, %306 : vector<16x1xf32>
    %308 = math.rsqrt %307 : vector<16x1xf32>
    %309 = vector.broadcast %308 : vector<16x1xf32> to vector<16x32xf32>
    %310 = arith.mulf %305, %309 : vector<16x32xf32>
    %311 = vector.broadcast %290 : vector<1x32xf32> to vector<16x32xf32>
    %312 = arith.mulf %310, %311 : vector<16x32xf32>
    %313 = vector.broadcast %292 : vector<1x32xf32> to vector<16x32xf32>
    %314 = arith.addf %312, %313 : vector<16x32xf32>
    %c1_130 = arith.constant 1 : index
    %c0_131 = arith.constant 0 : index
    %c0_132 = arith.constant 0 : index
    %315 = vector.load %arg13[%c1_130, %c0_131, %c0_132] : memref<2x32x64xf32, #tpu.memory_space<vmem>>, vector<1x32x64xf32>
    %316 = vector.shape_cast %315 : vector<1x32x64xf32> to vector<32x64xf32>
    %cst_133 = arith.constant dense<0.000000e+00> : vector<16x64xf32>
    %317 = tpu.matmul %314, %316, %cst_133 {dimension_numbers = #tpu.dot_dimension_numbers<[1], [0], [0], [1], [0, 0, 1, 1], [], []>} : vector<16x32xf32>, vector<32x64xf32>, vector<16x64xf32> -> vector<16x64xf32>
    %c1_134 = arith.constant 1 : index
    %c0_135 = arith.constant 0 : index
    %c0_136 = arith.constant 0 : index
    %318 = vector.load %arg14[%c1_134, %c0_135, %c0_136] : memref<2x1x64xf32, #tpu.memory_space<vmem>>, vector<1x1x64xf32>
    %319 = vector.shape_cast %318 : vector<1x1x64xf32> to vector<1x64xf32>
    %320 = vector.broadcast %319 : vector<1x64xf32> to vector<16x64xf32>
    %321 = arith.addf %317, %320 : vector<16x64xf32>
    %cst_137 = arith.constant 5.000000e-01 : f32
    %322 = vector.broadcast %cst_137 : f32 to vector<16x64xf32>
    %323 = arith.mulf %322, %321 : vector<16x64xf32>
    %cst_138 = arith.constant 4.471500e-02 : f32
    %324 = vector.broadcast %cst_138 : f32 to vector<16x64xf32>
    %325 = arith.mulf %324, %321 : vector<16x64xf32>
    %326 = arith.mulf %325, %321 : vector<16x64xf32>
    %327 = arith.mulf %326, %321 : vector<16x64xf32>
    %328 = arith.addf %321, %327 : vector<16x64xf32>
    %cst_139 = arith.constant 0.797884583 : f32
    %329 = vector.broadcast %cst_139 : f32 to vector<16x64xf32>
    %330 = arith.mulf %329, %328 : vector<16x64xf32>
    %331 = math.tanh %330 : vector<16x64xf32>
    %cst_140 = arith.constant 1.000000e+00 : f32
    %332 = vector.broadcast %cst_140 : f32 to vector<16x64xf32>
    %333 = arith.addf %332, %331 : vector<16x64xf32>
    %334 = arith.mulf %323, %333 : vector<16x64xf32>
    %c1_141 = arith.constant 1 : index
    %c0_142 = arith.constant 0 : index
    %c0_143 = arith.constant 0 : index
    %335 = vector.load %arg15[%c1_141, %c0_142, %c0_143] : memref<2x64x32xf32, #tpu.memory_space<vmem>>, vector<1x64x32xf32>
    %336 = vector.shape_cast %335 : vector<1x64x32xf32> to vector<64x32xf32>
    %cst_144 = arith.constant dense<0.000000e+00> : vector<16x32xf32>
    %337 = tpu.matmul %334, %336, %cst_144 {dimension_numbers = #tpu.dot_dimension_numbers<[1], [0], [0], [1], [0, 0, 1, 1], [], []>} : vector<16x64xf32>, vector<64x32xf32>, vector<16x32xf32> -> vector<16x32xf32>
    %c1_145 = arith.constant 1 : index
    %c0_146 = arith.constant 0 : index
    %c0_147 = arith.constant 0 : index
    %338 = vector.load %arg16[%c1_145, %c0_146, %c0_147] : memref<2x1x32xf32, #tpu.memory_space<vmem>>, vector<1x1x32xf32>
    %339 = vector.shape_cast %338 : vector<1x1x32xf32> to vector<1x32xf32>
    %340 = vector.broadcast %339 : vector<1x32xf32> to vector<16x32xf32>
    %341 = arith.addf %337, %340 : vector<16x32xf32>
    %342 = arith.addf %341, %314 : vector<16x32xf32>
    %c1_148 = arith.constant 1 : index
    %c0_149 = arith.constant 0 : index
    %c0_150 = arith.constant 0 : index
    %343 = vector.load %arg17[%c1_148, %c0_149, %c0_150] : memref<2x1x32xf32, #tpu.memory_space<vmem>>, vector<1x1x32xf32>
    %344 = vector.shape_cast %343 : vector<1x1x32xf32> to vector<1x32xf32>
    %c1_151 = arith.constant 1 : index
    %c0_152 = arith.constant 0 : index
    %c0_153 = arith.constant 0 : index
    %345 = vector.load %arg18[%c1_151, %c0_152, %c0_153] : memref<2x1x32xf32, #tpu.memory_space<vmem>>, vector<1x1x32xf32>
    %346 = vector.shape_cast %345 : vector<1x1x32xf32> to vector<1x32xf32>
    %cst_154 = arith.constant dense<0.000000e+00> : vector<16xf32>
    %347 = vector.multi_reduction <add>, %342, %cst_154 [1] : vector<16x32xf32> to vector<16xf32>
    %348 = vector.shape_cast %347 : vector<16xf32> to vector<16x1xf32>
    %cst_155 = arith.constant 3.200000e+01 : f32
    %349 = vector.broadcast %cst_155 : f32 to vector<16x1xf32>
    %350 = arith.divf %348, %349 : vector<16x1xf32>
    %351 = vector.broadcast %350 : vector<16x1xf32> to vector<16x32xf32>
    %352 = arith.subf %342, %351 : vector<16x32xf32>
    %353 = arith.mulf %352, %352 : vector<16x32xf32>
    %cst_156 = arith.constant dense<0.000000e+00> : vector<16xf32>
    %354 = vector.multi_reduction <add>, %353, %cst_156 [1] : vector<16x32xf32> to vector<16xf32>
    %355 = vector.shape_cast %354 : vector<16xf32> to vector<16x1xf32>
    %cst_157 = arith.constant 3.200000e+01 : f32
    %356 = vector.broadcast %cst_157 : f32 to vector<16x1xf32>
    %357 = arith.divf %355, %356 : vector<16x1xf32>
    %358 = vector.broadcast %350 : vector<16x1xf32> to vector<16x32xf32>
    %359 = arith.subf %342, %358 : vector<16x32xf32>
    %cst_158 = arith.constant 9.99999996E-13 : f32
    %360 = vector.broadcast %cst_158 : f32 to vector<16x1xf32>
    %361 = arith.addf %357, %360 : vector<16x1xf32>
    %362 = math.rsqrt %361 : vector<16x1xf32>
    %363 = vector.broadcast %362 : vector<16x1xf32> to vector<16x32xf32>
    %364 = arith.mulf %359, %363 : vector<16x32xf32>
    %365 = vector.broadcast %344 : vector<1x32xf32> to vector<16x32xf32>
    %366 = arith.mulf %364, %365 : vector<16x32xf32>
    %367 = vector.broadcast %346 : vector<1x32xf32> to vector<16x32xf32>
    %368 = arith.addf %366, %367 : vector<16x32xf32>
    %369 = vector.extract_strided_slice %368 {offsets = [0, 0], sizes = [1, 32], strides = [1, 1]} : vector<16x32xf32> to vector<1x32xf32>
    %370 = vector.extract_strided_slice %368 {offsets = [8, 0], sizes = [1, 32], strides = [1, 1]} : vector<16x32xf32> to vector<1x32xf32>
    %371 = tpu.concatenate %369, %370 in 0 : vector<1x32xf32>, vector<1x32xf32> -> vector<2x32xf32>
    %c0_159 = arith.constant 0 : index
    %c0_160 = arith.constant 0 : index
    %372 = vector.load %arg19[%c0_159, %c0_160] : memref<32x32xf32, #tpu.memory_space<vmem>>, vector<32x32xf32>
    %cst_161 = arith.constant dense<0.000000e+00> : vector<2x32xf32>
    %373 = tpu.matmul %371, %372, %cst_161 {dimension_numbers = #tpu.dot_dimension_numbers<[1], [0], [0], [1], [0, 0, 1, 1], [], []>} : vector<2x32xf32>, vector<32x32xf32>, vector<2x32xf32> -> vector<2x32xf32>
    %c0_162 = arith.constant 0 : index
    %c0_163 = arith.constant 0 : index
    %374 = vector.load %arg20[%c0_162, %c0_163] : memref<1x32xf32, #tpu.memory_space<vmem>>, vector<1x32xf32>
    %375 = vector.broadcast %374 : vector<1x32xf32> to vector<2x32xf32>
    %376 = arith.addf %373, %375 : vector<2x32xf32>
    %377 = math.tanh %376 : vector<2x32xf32>
    %c0_164 = arith.constant 0 : index
    %c0_165 = arith.constant 0 : index
    %378 = vector.load %arg21[%c0_164, %c0_165] : memref<32x3xf32, #tpu.memory_space<vmem>>, vector<32x3xf32>
    %cst_166 = arith.constant dense<0.000000e+00> : vector<2x3xf32>
    %379 = tpu.matmul %377, %378, %cst_166 {dimension_numbers = #tpu.dot_dimension_numbers<[1], [0], [0], [1], [0, 0, 1, 1], [], []>} : vector<2x32xf32>, vector<32x3xf32>, vector<2x3xf32> -> vector<2x3xf32>
    %c0_167 = arith.constant 0 : index
    %c0_168 = arith.constant 0 : index
    %380 = vector.load %arg22[%c0_167, %c0_168] : memref<1x3xf32, #tpu.memory_space<vmem>>, vector<1x3xf32>
    %381 = vector.broadcast %380 : vector<1x3xf32> to vector<2x3xf32>
    %382 = arith.addf %379, %381 : vector<2x3xf32>
    %cst_169 = arith.constant 0.000000e+00 : f32
    %383 = vector.broadcast %cst_169 : f32 to vector<2x125xf32>
    %384 = tpu.concatenate %382, %383 in 1 : vector<2x3xf32>, vector<2x125xf32> -> vector<2x128xf32>
    %c0_170 = arith.constant 0 : index
    %c0_171 = arith.constant 0 : index
    %385 = vector.load %arg23[%c0_170, %c0_171] : memref<2x128xf32, #tpu.memory_space<vmem>>, vector<2x128xf32>
    tpu.vector_store %arg23[%c0_170, %c0_171], %384 {strides = array<i32>} : memref<2x128xf32, #tpu.memory_space<vmem>>, vector<2x128xf32>,
    return
  }
}

</mosaic_0001>

<bundles_post_ra>
// kernel: eq.8
= control target key start
LH: loop header
LB: loop body
LE: loop exit
PB: predicated region body
PF: predicated region fallthrough
CT: control target
= control target key end

     0   :  { %vm7_vm0 = vcmask 64512   ;;  %vm13_vm1 = vcmask 130112   ;;  %s39_s0 = inlined_call_operand.vmem [shape: s32[2,8], index: 0, kind: input, shape index: {}]   ;;  %s40_s1 = inlined_call_operand.vmem [shape: s32[16], index: 1, kind: output, shape index: {}]  }
   0x1   :  { %v4_v0 = vld [vmem:[%s39_s0] sm:$0x3]  ;;  %s22_s0 = smov 8  }
   0x2   :  { %5 = vst [vmem:[#allocation1] sm:$0x3] %v4_v0 }
   0x9   :  { %v10_v1 = vld [vmem:[#allocation1 + $0x1] sm:$0x1]   ;;  %v6_v2 = vld [vmem:[#allocation1] sm:$0x1]  }
   0xa   :  { %11 = vrot.lane.b32.xlu0 %v10_v1, %s22_s0  ;;  %8 = vst.msk [vmem:[#allocation0] sm:$0x1] %vm7_vm0, %v6_v2  }
  0x7c   :  { %v12_v3 = vpop.permute.xlu0 %11  }
  0x7d   :  { %14 = vst.msk [vmem:[#allocation0] sm:$0x1] %vm13_vm1, %v12_v3  }
  0x84   :  { %v17_v4 = vld [vmem:[#allocation0] sm:$0x1] }
  0x85   :  { %20 = vst [vmem:[%s40_s1] sm:$0x1] %v17_v4 }

// kernel: bert_classifier_forward.1
= control target key start
LH: loop header
LB: loop body
LE: loop exit
PB: predicated region body
PF: predicated region fallthrough
CT: control target
= control target key end

     0   :  { %s2711_s0 = inlined_call_operand.vmem [shape: s32[16,1], index: 0, kind: input, shape index: {}]   ;;  %s2712_s1 = inlined_call_operand.vmem [shape: f32[16,16], index: 1, kind: input, shape index: {}]   ;;  %s2713_s2 = inlined_call_operand.vmem [shape: f32[128,32], index: 2, kind: input, shape index: {}]   ;;  %s2714_s3 = inlined_call_operand.vmem [shape: f32[16,32], index: 3, kind: input, shape index: {}]   ;;  %s2715_s4 = inlined_call_operand.vmem [shape: f32[2,32], index: 4, kind: input, shape index: {}]   ;;  %s2716_s5 = inlined_call_operand.vmem [shape: f32[1,32], index: 5, kind: input, shape index: {}]   ;;  %s2717_s6 = inlined_call_operand.vmem [shape: f32[1,32], index: 6, kind: input, shape index: {}]   ;;  %s2718_s7 = inlined_call_operand.vmem [shape: f32[2,32,96], index: 7, kind: input, shape index: {}]   ;;  %s2719_s8 = inlined_call_operand.vmem [shape: f32[2,1,96], index: 8, kind: input, shape index: {}]   ;;  %s2720_s9 = inlined_call_operand.vmem [shape: f32[2,32,32], index: 9, kind: input, shape index: {}]   ;;  %s2721_s10 = inlined_call_operand.vmem [shape: f32[2,1,32], index: 10, kind: input, shape index: {}]   ;;  %s2722_s11 = inlined_call_operand.vmem [shape: f32[2,1,32], index: 11, kind: input, shape index: {}]   ;;  %s2723_s12 = inlined_call_operand.vmem [shape: f32[2,1,32], index: 12, kind: input, shape index: {}]   ;;  %s2724_s13 = inlined_call_operand.vmem [shape: f32[2,32,64], index: 13, kind: input, shape index: {}]   ;;  %s2725_s14 = inlined_call_operand.vmem [shape: f32[2,1,64], index: 14, kind: input, shape index: {}]   ;;  %s2726_s15 = inlined_call_operand.vmem [shape: f32[2,64,32], index: 15, kind: input, shape index: {}]   ;;  %s2727_s16 = inlined_call_operand.vmem [shape: f32[2,1,32], index: 16, kind: input, shape index: {}]   ;;  %s2728_s17 = inlined_call_operand.vmem [shape: f32[2,1,32], index: 17, kind: input, shape index: {}]   ;;  %s2729_s18 = inlined_call_operand.vmem [shape: f32[2,1,32], index: 18, kind: input, shape index: {}]   ;;  %s2730_s19 = inlined_call_operand.vmem [shape: f32[32,32], index: 19, kind: input, shape index: {}]   ;;  %s2731_s20 = inlined_call_operand.vmem [shape: f32[1,32], index: 20, kind: input, shape index: {}]   ;;  %s2732_s21 = inlined_call_operand.vmem [shape: f32[32,3], index: 21, kind: input, shape index: {}]   ;;  %s2733_s22 = inlined_call_operand.vmem [shape: f32[1,3], index: 22, kind: input, shape index: {}]   ;;  %s2734_s23 = inlined_call_operand.hbm [shape: f32[2,128], index: 23, kind: output, shape index: {}]  }
   0x1   :  { %2754 = sst [smem:[#allocation5_spill]] %s2711_s0 }
   0x2   :  { %2755 = sst [smem:[#allocation6_spill]] %s2712_s1 }
   0x3   :  { %2756 = sst [smem:[#allocation7_spill]] %s2713_s2 }
   0x4   :  { %2757 = sst [smem:[#allocation8_spill]] %s2714_s3 }
   0x5   :  { %2758 = sst [smem:[#allocation9_spill]] %s2715_s4 }
   0x6   :  { %2759 = sst [smem:[#allocation10_spill]] %s2716_s5 }
   0x7   :  { %2760 = sst [smem:[#allocation11_spill]] %s2717_s6 }
   0x8   :  { %2761 = sst [smem:[#allocation12_spill]] %s2718_s7 }
   0x9   :  { %2762 = sst [smem:[#allocation13_spill]] %s2729_s18 }
   0xa   :  { %s2763_s24 = sld [smem:[#allocation5_spill]]  ;;  %v2007_v2 = vmov 0  }
   0xb   :  { %s2764_s18 = sld [smem:[#allocation7_spill]]  ;;  %1823 = vset.pattern.permute.xlu0 %v2007_v2 }
  0x10   :  { %v77_v0 = vld [vmem:[%s2763_s24] sm:$0xff]  ;;  %v78_v6 = vld [vmem:[%s2763_s24 + $0x8] sm:$0xff] }
  0x11   :  { %v106_v1 = vld [vmem:[%s2764_s18 + $0x78] sm:$0xff]  ;;  %v105_v3 = vld [vmem:[%s2764_s18 + $0x70] sm:$0xff]  ;;  %80 = vperm.xlu0 %1823, %v77_v0   ;;  %v104_v4 = vld [vmem:[%s2764_s18 + $0x68] sm:$0xff] }
  0x12   :  { %111 = vmatpush.msra.mxu0 %v106_v1  ;;  %v103_v5 = vld [vmem:[%s2764_s18 + $0x60] sm:$0xff]  ;;  %v102_v7 = vld [vmem:[%s2764_s18 + $0x58] sm:$0xff]  ;;  %v101_v8 = vld [vmem:[%s2764_s18 + $0x50] sm:$0xff] }
  0x13   :  { %v100_v9 = vld [vmem:[%s2764_s18 + $0x48] sm:$0xff]  ;;  %v99_v10 = vld [vmem:[%s2764_s18 + $0x40] sm:$0xff] }
  0x14   :  { %112 = vmatpush.msra.mxu0 %v105_v3 }
  0x16   :  { %113 = vmatpush.msra.mxu0 %v104_v4 }
  0x18   :  { %114 = vmatpush.msra.mxu0 %v103_v5 }
  0x19   :  { %83 = vperm.xlu0 %1823, %v78_v6  }
  0x1a   :  { %115 = vmatpush.msra.mxu0 %v102_v7 }
  0x1c   :  { %116 = vmatpush.msra.mxu0 %v101_v8 }
  0x1d   :  { %28 = vsyncpa [#allocation3], 0  ;;  %v98_v11 = vld [vmem:[%s2764_s18 + $0x38] sm:$0xff]  ;;  %v97_v12 = vld [vmem:[%s2764_s18 + $0x30] sm:$0xff]  ;;  %v75_v19 = vlaneseq  ;;  %v2008_v22 = vmov 1.0   ;;  %s2765_s27 = sld [smem:[#allocation9_spill]] }
  0x1e   :  { %117 = vmatpush.msra.mxu0 %v100_v9  ;;  %v96_v13 = vld [vmem:[%s2764_s18 + $0x28] sm:$0xff]  ;;  %v95_v14 = vld [vmem:[%s2764_s18 + $0x20] sm:$0xff]  ;;  %v94_v15 = vld [vmem:[%s2764_s18 + $0x18] sm:$0xff]  ;;  %s2766_s29 = sld [smem:[#allocation8_spill]]  ;;  %vm136_vm2 = vcmask 261120   ;;  %v2009_v33 = vmov 32.0  }
  0x1f   :  { %v93_v16 = vld [vmem:[%s2764_s18 + $0x10] sm:$0xff]  ;;  %v92_v17 = vld [vmem:[%s2764_s18 + $0x8] sm:$0xff]  ;;  %v91_v18 = vld [vmem:[%s2764_s18] sm:$0xff]  ;;  %v76_v20 = vand.u32 127, %v75_v19  ;;  %1885 = vrcp.f32 %v2009_v33  ;;  %s2767_s0 = sld [smem:[#allocation12_spill]]  ;;  %s2010_s3 = smov 96  }
  0x20   :  { %118 = vmatpush.msra.mxu0 %v99_v10  ;;  %s2768_s6 = sld [smem:[#allocation10_spill]]  ;;  %vm245_vm10 = vcmask 64512   ;;  %vm279_vm11 = vcmask 130048   ;;  %s2744_s26 = smov 64   ;;  %vm653_vm12 = vcmask 195584  }
  0x21   :  { %s2769_s28 = sld [smem:[#allocation11_spill]]  ;;  %s2012_s24 = smov 120  }
  0x22   :  { %119 = vmatpush.msra.mxu0 %v98_v11  ;;  %s2770_s25 = sld [smem:[#allocation6_spill]]  ;;  %s2013_s2 = smov 80  }
  0x23   :  { %v1864_v24 = vld [vmem:[%s2765_s27] ss:$0 sm:$0xff]  ;;  %s2015_s27 = smov 88   ;;  %s2752_s7 = smov 112  }
  0x24   :  { %120 = vmatpush.msra.mxu0 %v97_v12  ;;  %v107_v25 = vld [vmem:[%s2766_s29] sm:$0xff]  ;;  %s2748_s29 = smov 104   ;;  %s2741_s18 = smov 48  }
  0x25   :  { %v110_v26 = vadd.f32 %v1864_v24, %v107_v25  ;;  %v1886_v34 = vpop.eup %1885  ;;  %v203_v50 = vld [vmem:[%s2767_s0 + $0x18] sm:$0xff]  ;;  %v202_v51 = vld [vmem:[%s2767_s0 + $0x10] sm:$0xff]  ;;  %v201_v52 = vld [vmem:[%s2767_s0 + $0x8] sm:$0xff]  ;;  %s2740_s4 = smov 40   ;;  %s2742_s30 = smov 8  }
  0x26   :  { %121 = vmatpush.msra.mxu0 %v96_v13  ;;  %v144_v35 = vmul.f32 32.0, %v1886_v34  ;;  %vm148_vm3 = vweird.f32 %v1886_v34  ;;  %226 = vmatpush.msra.mxu1 %v203_v50  ;;  %v200_v53 = vld [vmem:[%s2767_s0] sm:$0xff]  ;;  %s2750_s5 = smov 24   ;;  %s2771_s1 = sld [smem:[#allocation13_spill]] }
  0x27   :  { %v1865_v4 = vld [vmem:[%s2768_s6] ss:$0 sm:$0xff]  ;;  %s2014_s6 = smov 72  }
  0x28   :  { %122 = vmatpush.msra.mxu0 %v95_v14  ;;  %v145_v36 = vsub.f32 1.0, %v144_v35  ;;  %227 = vmatpush.msra.mxu1 %v202_v51  ;;  %v1866_v8 = vld [vmem:[%s2769_s28] ss:$0 sm:$0xff]  ;;  %s2745_s28 = smov 56  }
  0x2a   :  { %123 = vmatpush.msra.mxu0 %v94_v15  ;;  %v146_v37 = vmul.f32 %v1886_v34, %v145_v36  ;;  %228 = vmatpush.msra.mxu1 %v201_v52 }
  0x2c   :  { %124 = vmatpush.msra.mxu0 %v93_v16  ;;  %v147_v38 = vadd.f32 %v1886_v34, %v146_v37  ;;  %229 = vmatpush.msra.mxu1 %v200_v53 }
  0x2e   :  { %125 = vmatpush.msra.mxu0 %v92_v17  ;;  %v2207_v39 = vsel %vm148_vm3, %v1886_v34, %v147_v38 }
  0x30   :  { %126 = vmatpush.msra.mxu0 %v91_v18  ;;  %v1867_v18 = vld [vmem:[%s2719_s8] ss:$0 sm:$0xff] }
  0x83   :  { %v81_v21 = vpop.permute.xlu0 %80 }
  0x84   :  { %vm85_vm0 = vcmp.eq.s32.totalorder %v76_v20, %v81_v21 }
  0x85   :  { %1709 = vmatmul.msk.f32.vlgmr.msra.gmra.mxu0 %vm85_vm0, %v2008_v22 }
  0x8b   :  { %v84_v23 = vpop.permute.xlu0 %83 }
  0x8c   :  { %vm86_vm1 = vcmp.eq.s32.totalorder %v76_v20, %v84_v23 }
  0x8d   :  { %1710 = vmatmul.msk.f32.gmra.mxu0 %vm86_vm1, %v2008_v22 }
 0x102   :  { %v128_v27 = vpop.f32.mrf.mxu0 }
 0x103   :  { %v129_v28 = vadd.f32 %v128_v27, %v110_v26  ;;  %v2267_v27 = vld [vmem:[%s2770_s25] sm:$0xff] }
 0x105   :  { %v137_v29 = vsel %vm136_vm2, %v129_v28, 0.0 }
 0x106   :  { %138 = vadd.xlane.f32.xlu1 %v137_v29 }
 0x10a   :  { %v131_v30 = vpop.f32.mrf.mxu0 }
 0x10b   :  { %v132_v31 = vadd.f32 %v131_v30, %v110_v26 }
 0x10d   :  { %v140_v32 = vsel %vm136_vm2, %v132_v31, 0.0 }
 0x10e   :  { %141 = vadd.xlane.f32.xlu1 %v140_v32 }
 0x179   :  { %v139_v40 = vpop.xlane.xlu1 %138 }
 0x17a   :  { %v150_v41 = vmul.f32 %v2207_v39, %v139_v40 }
 0x17c   :  { %v152_v42 = vsub.f32 %v129_v28, %v150_v41 }
 0x17e   :  { %v154_v43 = vmul.f32 %v152_v42, %v152_v42 }
 0x180   :  { %v156_v44 = vsel %vm136_vm2, %v154_v43, 0.0 }
 0x181   :  { %157 = vadd.xlane.f32.xlu2 %v156_v44  ;;  %v142_v45 = vpop.xlane.xlu1 %141 }
 0x182   :  { %v151_v46 = vmul.f32 %v2207_v39, %v142_v45 }
 0x184   :  { %v153_v47 = vsub.f32 %v132_v31, %v151_v46  ;;  %v2274_v31 = vld [vmem:[%s2770_s25 + $0x8] sm:$0xff]  ;;  %s2746_s25 = smov 16  }
 0x186   :  { %v155_v48 = vmul.f32 %v153_v47, %v153_v47 }
 0x188   :  { %v159_v49 = vsel %vm136_vm2, %v155_v48, 0.0 }
 0x189   :  { %160 = vadd.xlane.f32.xlu2 %v159_v49 }
 0x1f4   :  { %v158_v54 = vpop.xlane.xlu2 %157 }
 0x1f5   :  { %v162_v55 = vmul.f32 %v158_v54, %v2207_v39 }
 0x1f7   :  { %v164_v56 = vadd.f32 1e-12, %v162_v55 }
 0x1f9   :  { %1887 = vrsqrt.f32 %v164_v56  ;;  %vm172_vm5 = vweird.f32 %v164_v56 }
 0x1fc   :  { %v161_v57 = vpop.xlane.xlu2 %160 }
 0x1fd   :  { %v163_v58 = vmul.f32 %v161_v57, %v2207_v39 }
 0x1ff   :  { %v1888_v59 = vpop.eup %1887  ;;  %v165_v60 = vadd.f32 1e-12, %v163_v58 }
 0x200   :  { %v167_v61 = vmul.f32 %v1888_v59, %v164_v56  ;;  %vm173_vm4 = vweird.f32 %v1888_v59 }
 0x201   :  { %1889 = vrsqrt.f32 %v165_v60  ;;  %vm174_vm6 = vmor %vm172_vm5, %vm173_vm4  ;;  %vm182_vm8 = vweird.f32 %v165_v60  ;;  %vm818_vm4 = vcmask 523264  }
 0x202   :  { %v168_v62 = vmul.f32 %v1888_v59, %v167_v61 }
 0x204   :  { %v169_v63 = vmul.f32 0.5, %v168_v62 }
 0x206   :  { %v170_v0 = vsub.f32 1.5, %v169_v63 }
 0x207   :  { %v1890_v1 = vpop.eup %1889 }
 0x208   :  { %v171_v2 = vmul.f32 %v1888_v59, %v170_v0  ;;  %v177_v3 = vmul.f32 %v1890_v1, %v165_v60  ;;  %vm183_vm7 = vweird.f32 %v1890_v1 }
 0x209   :  { %vm184_vm9 = vmor %vm182_vm8, %vm183_vm7 }
 0x20a   :  { %v175_v5 = vsel %vm174_vm6, %v1888_v59, %v171_v2  ;;  %v178_v6 = vmul.f32 %v1890_v1, %v177_v3 }
 0x20b   :  { %v186_v7 = vmul.f32 %v175_v5, %v152_v42 }
 0x20c   :  { %v179_v9 = vmul.f32 0.5, %v178_v6 }
 0x20d   :  { %v191_v10 = vmul.f32 %v1865_v4, %v186_v7 }
 0x20e   :  { %v180_v11 = vsub.f32 1.5, %v179_v9 }
 0x20f   :  { %v2233_v12 = vadd.f32 %v1866_v8, %v191_v10 }
 0x210   :  { %v181_v13 = vmul.f32 %v1890_v1, %v180_v11 }
 0x211   :  { %1711 = vmatmul.msk.f32.vlgmr.msra.gmra.mxu1 %vm136_vm2, %v2233_v12 }
 0x212   :  { %v185_v14 = vsel %vm184_vm9, %v1890_v1, %v181_v13 }
 0x213   :  { %v187_v15 = vmul.f32 %v185_v14, %v153_v47 }
 0x215   :  { %v192_v16 = vmul.f32 %v1865_v4, %v187_v15 }
 0x217   :  { %v2237_v17 = vadd.f32 %v1866_v8, %v192_v16 }
 0x219   :  { %1712 = vmatmul.msk.f32.gmra.mxu1 %vm136_vm2, %v2237_v17 }
 0x28e   :  { %v231_v19 = vpop.f32.mrf.mxu1 }
 0x28f   :  { %v2244_v20 = vadd.f32 %v1867_v18, %v231_v19 }
 0x291   :  { %241 = vrot.lane.b32.xlu1 %v2244_v20, %s2010_s3  ;;  %v2255_v25 = vmul.f32 0.35355338, %v2244_v20 }
 0x296   :  { %v234_v21 = vpop.f32.mrf.mxu1 }
 0x297   :  { %v2248_v22 = vadd.f32 %v1867_v18, %v234_v21 }
 0x299   :  { %243 = vrot.lane.b32.xlu0 %v2248_v22, %s2010_s3  ;;  %v2260_v26 = vmul.f32 0.35355338, %v2248_v22  ;;  %v2280_v35 = vpack.i.bf16 %v2244_v20, %v2248_v22 }
 0x303   :  { %v242_v24 = vpop.permute.xlu1 %241 }
 0x30b   :  { %v244_v23 = vpop.permute.xlu0 %243 }
 0x30c   :  { %1713 = vmatpush.xpose.msk.msra.mxu2 %vm245_vm10, %v244_v23 }
 0x310   :  { %1714 = vmatpush.xpose.msk.msra.mxu2 %vm245_vm10, %v242_v24 }
 0x313   :  { %1715 = vmatmul.msk.f32.vlgmr.msra.gmra.mxu2 %vm245_vm10, %v2255_v25 }
 0x31b   :  { %1716 = vmatmul.msk.f32.gmra.mxu2 %vm245_vm10, %v2260_v26 }
 0x396   :  { %v273_v28 = vpop.f32.mrf.mxu2 }
 0x397   :  { %v274_v29 = vadd.f32 %v273_v28, %v2267_v27 }
 0x399   :  { %v280_v30 = vsel %vm279_vm11, %v274_v29, -inf }
 0x39a   :  { %281 = vmax.xlane.f32.xlu2 %v280_v30 }
 0x39e   :  { %v276_v32 = vpop.f32.mrf.mxu2 }
 0x39f   :  { %v277_v33 = vadd.f32 %v276_v32, %v2274_v31 }
 0x3a1   :  { %v283_v34 = vsel %vm279_vm11, %v277_v33, -inf }
 0x3a2   :  { %284 = vmax.xlane.f32.xlu0 %v283_v34 }
 0x3b2   :  { %1825 = vrot.lane.b32.xlu2 %v2280_v35, %s2744_s26 }
 0x3b6   :  { %337 = vrot.lane.b32.xlu0 %v2255_v25, %s2012_s24 }
 0x3be   :  { %437 = vrot.lane.b32.xlu0 %v2244_v20, %s2013_s2 }
 0x3c6   :  { %535 = vrot.lane.b32.xlu0 %v2248_v22, %s2014_s6 }
 0x40d   :  { %v282_v36 = vpop.xlane.xlu2 %281 }
 0x40e   :  { %v286_v37 = vsub.f32 %v274_v29, %v282_v36 }
 0x410   :  { %v288_v38 = vmul.f32 1.442695, %v286_v37 }
 0x412   :  { %1891 = vpow2.f32 %v288_v38 }
 0x415   :  { %v285_v40 = vpop.xlane.xlu0 %284  ;;  %v1826_v41 = vpop.permute.xlu2 %1825 }
 0x416   :  { %v287_v42 = vsub.f32 %v277_v33, %v285_v40  ;;  %v1827_v43 = vunpack.i.l.bf16 %v1826_v41  ;;  %v1828_v46 = vunpack.i.h.bf16 %v1826_v41 }
 0x418   :  { %v1892_v44 = vpop.eup %1891  ;;  %v290_v45 = vmul.f32 1.442695, %v287_v42  ;;  %328 = vmatpush.msra.mxu3 %v1827_v43 }
 0x419   :  { %v292_v47 = vsel %vm279_vm11, %v1892_v44, 0.0 }
 0x41a   :  { %1893 = vpow2.f32 %v290_v45  ;;  %293 = vadd.xlane.f32.xlu2 %v292_v47  ;;  %329 = vmatpush.msra.mxu3 %v1828_v46 }
 0x420   :  { %v1894_v48 = vpop.eup %1893 }
 0x421   :  { %v295_v49 = vsel %vm279_vm11, %v1894_v48, 0.0 }
 0x422   :  { %296 = vadd.xlane.f32.xlu1 %v295_v49 }
 0x428   :  { %v338_v58 = vpop.permute.xlu0 %337 }
 0x430   :  { %v438_v13 = vpop.permute.xlu0 %437 }
 0x432   :  { %343 = vrot.lane.b32.xlu2 %v2248_v22, %s2015_s27 }
 0x43a   :  { %341 = vrot.lane.b32.xlu2 %v2244_v20, %s2015_s27 }
 0x442   :  { %339 = vrot.lane.b32.xlu2 %v2260_v26, %s2012_s24 }
 0x48d   :  { %v294_v50 = vpop.xlane.xlu2 %293 }
 0x48e   :  { %1895 = vrcp.f32 %v294_v50 }
 0x494   :  { %v1896_v51 = vpop.eup %1895 }
 0x495   :  { %v297_v52 = vpop.xlane.xlu1 %296  ;;  %v344_v53 = vpop.permute.xlu2 %343  ;;  %v300_v54 = vmul.f32 %v1896_v51, %v1892_v44 }
 0x496   :  { %1897 = vrcp.f32 %v297_v52  ;;  %1719 = vmatpush.xpose.msk.msrb.mxu3 %vm245_vm10, %v344_v53 }
 0x497   :  { %1717 = vmatmul.msk.f32.vlgmr.msra.gmra.mxu3 %vm279_vm11, %v300_v54 }
 0x49c   :  { %v1898_v55 = vpop.eup %1897 }
 0x49d   :  { %v342_v56 = vpop.permute.xlu2 %341  ;;  %v301_v57 = vmul.f32 %v1898_v55, %v1894_v48 }
 0x49e   :  { %1720 = vmatpush.xpose.msk.msrb.mxu3 %vm245_vm10, %v342_v56 }
 0x49f   :  { %1718 = vmatmul.msk.f32.gmra.mxu3 %vm279_vm11, %v301_v57 }
 0x4a5   :  { %v340_v59 = vpop.permute.xlu2 %339 }
 0x4a7   :  { %1721 = vmatmul.msk.f32.vlgmr.msrb.gmra.mxu3 %vm245_vm10, %v338_v58 }
 0x4af   :  { %1722 = vmatmul.msk.f32.gmra.mxu3 %vm245_vm10, %v340_v59 }
 0x51a   :  { %v2304_v60 = vpop.f32.mrf.mxu3 }
 0x522   :  { %v2306_v61 = vpop.f32.mrf.mxu3 }
 0x52a   :  { %v370_v62 = vpop.f32.mrf.mxu3 }
 0x52b   :  { %v371_v63 = vadd.f32 %v370_v62, %v2267_v27 }
 0x52d   :  { %v376_v0 = vsel %vm279_vm11, %v371_v63, -inf }
 0x52e   :  { %377 = vmax.xlane.f32.xlu2 %v376_v0 }
 0x532   :  { %v373_v1 = vpop.f32.mrf.mxu3 }
 0x533   :  { %v374_v2 = vadd.f32 %v373_v1, %v2274_v31 }
 0x535   :  { %v379_v3 = vsel %vm279_vm11, %v374_v2, -inf }
 0x536   :  { %380 = vmax.xlane.f32.xlu1 %v379_v3 }
 0x546   :  { %439 = vrot.lane.b32.xlu2 %v2248_v22, %s2013_s2  ;;  %v536_v22 = vpop.permute.xlu0 %535 }
 0x54e   :  { %433 = vrot.lane.b32.xlu2 %v2255_v25, %s2752_s7 }
 0x54f   :  { %1830 = vrot.lane.b32.xlu1 %v2280_v35, %s2745_s28 }
 0x556   :  { %533 = vrot.lane.b32.xlu2 %v2244_v20, %s2014_s6 }
 0x55e   :  { %531 = vrot.lane.b32.xlu2 %v2260_v26, %s2748_s29 }
 0x5a1   :  { %v378_v4 = vpop.xlane.xlu2 %377 }
 0x5a2   :  { %v382_v5 = vsub.f32 %v371_v63, %v378_v4 }
 0x5a4   :  { %v384_v6 = vmul.f32 1.442695, %v382_v5 }
 0x5a6   :  { %1899 = vpow2.f32 %v384_v6 }
 0x5a9   :  { %v381_v7 = vpop.xlane.xlu1 %380  ;;  %v440_v8 = vpop.permute.xlu2 %439 }
 0x5aa   :  { %v383_v9 = vsub.f32 %v374_v2, %v381_v7  ;;  %1725 = vmatpush.xpose.msk.msrb.mxu2 %vm245_vm10, %v440_v8 }
 0x5ac   :  { %v1900_v10 = vpop.eup %1899  ;;  %v386_v11 = vmul.f32 1.442695, %v383_v9 }
 0x5ad   :  { %v388_v14 = vsel %vm279_vm11, %v1900_v10, 0.0 }
 0x5ae   :  { %1901 = vpow2.f32 %v386_v11  ;;  %389 = vadd.xlane.f32.xlu0 %v388_v14  ;;  %1726 = vmatpush.xpose.msk.msrb.mxu2 %vm245_vm10, %v438_v13 }
 0x5b1   :  { %v434_v15 = vpop.permute.xlu2 %433 }
 0x5b2   :  { %1727 = vmatmul.msk.f32.vlgmr.msrb.gmra.mxu2 %vm245_vm10, %v434_v15 }
 0x5b4   :  { %v1902_v16 = vpop.eup %1901 }
 0x5b5   :  { %v391_v18 = vsel %vm279_vm11, %v1902_v16, 0.0 }
 0x5b6   :  { %392 = vadd.xlane.f32.xlu1 %v391_v18 }
 0x5b9   :  { %v534_v23 = vpop.permute.xlu2 %533 }
 0x5c1   :  { %v1831_v19 = vpop.permute.xlu1 %1830  ;;  %v532_v38 = vpop.permute.xlu2 %531 }
 0x5c2   :  { %529 = vrot.lane.b32.xlu0 %v2255_v25, %s2748_s29  ;;  %v1832_v20 = vunpack.i.l.bf16 %v1831_v19  ;;  %v1833_v21 = vunpack.i.h.bf16 %v1831_v19  ;;  %s2778_s29 = smov 8  }
 0x5c4   :  { %424 = vmatpush.msrb.mxu1 %v1832_v20 }
 0x5c6   :  { %425 = vmatpush.msrb.mxu1 %v1833_v21 }
 0x5c8   :  { %1731 = vmatpush.xpose.msk.msra.mxu1 %vm245_vm10, %v536_v22 }
 0x5cc   :  { %1732 = vmatpush.xpose.msk.msra.mxu1 %vm245_vm10, %v534_v23 }
 0x5cf   :  { %435 = vrot.lane.b32.xlu1 %v2260_v26, %s2752_s7 }
 0x621   :  { %v390_v24 = vpop.xlane.xlu0 %389 }
 0x622   :  { %1903 = vrcp.f32 %v390_v24 }
 0x628   :  { %v1904_v28 = vpop.eup %1903 }
 0x629   :  { %v393_v29 = vpop.xlane.xlu1 %392  ;;  %v396_v30 = vmul.f32 %v1904_v28, %v1900_v10 }
 0x62a   :  { %1905 = vrcp.f32 %v393_v29 }
 0x62b   :  { %1723 = vmatmul.msk.f32.vlgmr.msrb.gmra.mxu1 %vm279_vm11, %v396_v30 }
 0x630   :  { %v1906_v25 = vpop.eup %1905 }
 0x631   :  { %v397_v32 = vmul.f32 %v1906_v25, %v1902_v16 }
 0x633   :  { %1724 = vmatmul.msk.f32.gmra.mxu1 %vm279_vm11, %v397_v32 }
 0x634   :  { %v530_v37 = vpop.permute.xlu0 %529 }
 0x635   :  { %v466_v33 = vpop.f32.mrf.mxu2 }
 0x636   :  { %v467_v34 = vadd.f32 %v466_v33, %v2267_v27 }
 0x638   :  { %v472_v36 = vsel %vm279_vm11, %v467_v34, -inf }
 0x639   :  { %473 = vmax.xlane.f32.xlu0 %v472_v36  ;;  %v659_v36 = vld [vmem:[%s2720_s9 + $0x18] sm:$0xff] }
 0x63a   :  { %682 = vmatpush.msrb.mxu0 %v659_v36 }
 0x63b   :  { %1733 = vmatmul.msk.f32.vlgmr.msra.gmra.mxu1 %vm245_vm10, %v530_v37  ;;  %v658_v37 = vld [vmem:[%s2720_s9 + $0x10] sm:$0xff] }
 0x63c   :  { %683 = vmatpush.msrb.mxu0 %v658_v37 }
 0x641   :  { %v436_v26 = vpop.permute.xlu1 %435 }
 0x642   :  { %1728 = vmatmul.msk.f32.gmra.mxu2 %vm245_vm10, %v436_v26  ;;  %v657_v26 = vld [vmem:[%s2720_s9 + $0x8] sm:$0xff] }
 0x643   :  { %1734 = vmatmul.msk.f32.gmra.mxu1 %vm245_vm10, %v532_v38  ;;  %684 = vmatpush.msrb.mxu0 %v657_v26  ;;  %v656_v38 = vld [vmem:[%s2720_s9] sm:$0xff] }
 0x645   :  { %685 = vmatpush.msrb.mxu0 %v656_v38 }
 0x6a8   :  { %v427_v40 = vpop.f32.mrf.mxu1 }
 0x6ac   :  { %v474_v41 = vpop.xlane.xlu0 %473 }
 0x6ad   :  { %v478_v43 = vsub.f32 %v467_v34, %v474_v41 }
 0x6af   :  { %v480_v44 = vmul.f32 1.442695, %v478_v43 }
 0x6b0   :  { %v2340_v42 = vpop.f32.mrf.mxu1 }
 0x6b1   :  { %1907 = vpow2.f32 %v480_v44 }
 0x6b7   :  { %v1908_v48 = vpop.eup %1907 }
 0x6b8   :  { %v562_v45 = vpop.f32.mrf.mxu1  ;;  %v484_v51 = vsel %vm279_vm11, %v1908_v48, 0.0 }
 0x6b9   :  { %v563_v46 = vadd.f32 %v562_v45, %v2267_v27 }
 0x6bb   :  { %v568_v47 = vsel %vm279_vm11, %v563_v46, -inf }
 0x6bc   :  { %569 = vmax.xlane.f32.xlu2 %v568_v47 }
 0x6c0   :  { %v565_v49 = vpop.f32.mrf.mxu1 }
 0x6c1   :  { %v566_v50 = vadd.f32 %v565_v49, %v2274_v31 }
 0x6c3   :  { %v571_v52 = vsel %vm279_vm11, %v566_v50, -inf }
 0x6c4   :  { %485 = vadd.xlane.f32.xlu2 %v484_v51  ;;  %572 = vmax.xlane.f32.xlu0 %v571_v52 }
 0x6c5   :  { %v469_v53 = vpop.f32.mrf.mxu2 }
 0x6c6   :  { %v470_v54 = vadd.f32 %v469_v53, %v2274_v31 }
 0x6c8   :  { %v475_v55 = vsel %vm279_vm11, %v470_v54, -inf }
 0x6c9   :  { %476 = vmax.xlane.f32.xlu1 %v475_v55 }
 0x6dc   :  { %1835 = vrot.lane.b32.xlu2 %v2280_v35, %s2741_s18  ;;  %s2779_s18 = smov 24  }
 0x6e2   :  { %1840 = vrot.lane.b32.xlu1 %v2280_v35, %s2740_s4  ;;  %s2780_s4 = smov 16  }
 0x72f   :  { %v570_v56 = vpop.xlane.xlu2 %569 }
 0x730   :  { %v574_v62 = vsub.f32 %v563_v46, %v570_v56 }
 0x732   :  { %v576_v4 = vmul.f32 1.442695, %v574_v62 }
 0x737   :  { %v486_v57 = vpop.xlane.xlu2 %485  ;;  %v573_v6 = vpop.xlane.xlu0 %572 }
 0x738   :  { %1909 = vrcp.f32 %v486_v57  ;;  %v575_v7 = vsub.f32 %v566_v50, %v573_v6  ;;  %v753_v6 = vld [vmem:[%s2724_s13 + $0x10] sm:$0xff] }
 0x73a   :  { %v578_v9 = vmul.f32 1.442695, %v575_v7  ;;  %v751_v7 = vld [vmem:[%s2724_s13] sm:$0xff] }
 0x73c   :  { %v477_v58 = vpop.xlane.xlu1 %476 }
 0x73d   :  { %v479_v59 = vsub.f32 %v470_v54, %v477_v58 }
 0x73e   :  { %v1910_v1 = vpop.eup %1909 }
 0x73f   :  { %v482_v63 = vmul.f32 1.442695, %v479_v59  ;;  %v1836_v0 = vpop.permute.xlu2 %1835  ;;  %v492_v5 = vmul.f32 %v1910_v1, %v1908_v48 }
 0x740   :  { %v1837_v2 = vunpack.i.l.bf16 %v1836_v0  ;;  %v1838_v3 = vunpack.i.h.bf16 %v1836_v0 }
 0x741   :  { %1911 = vpow2.f32 %v482_v63 }
 0x742   :  { %520 = vmatpush.msra.mxu3 %v1837_v2  ;;  %1913 = vpow2.f32 %v576_v4 }
 0x743   :  { %1915 = vpow2.f32 %v578_v9 }
 0x744   :  { %521 = vmatpush.msra.mxu3 %v1838_v3 }
 0x745   :  { %1729 = vmatmul.msk.f32.vlgmr.msra.gmra.mxu3 %vm279_vm11, %v492_v5 }
 0x747   :  { %v1912_v35 = vpop.eup %1911 }
 0x748   :  { %v487_v8 = vsel %vm279_vm11, %v1912_v35, 0.0  ;;  %v1914_v10 = vpop.eup %1913 }
 0x749   :  { %488 = vadd.xlane.f32.xlu0 %v487_v8  ;;  %v580_v11 = vsel %vm279_vm11, %v1914_v10, 0.0  ;;  %v1916_v14 = vpop.eup %1915 }
 0x74a   :  { %v583_v18 = vsel %vm279_vm11, %v1916_v14, 0.0 }
 0x751   :  { %581 = vadd.xlane.f32.xlu0 %v580_v11 }
 0x754   :  { %v1841_v13 = vpop.permute.xlu1 %1840 }
 0x755   :  { %v1842_v15 = vunpack.i.l.bf16 %v1841_v13  ;;  %v1843_v16 = vunpack.i.h.bf16 %v1841_v13 }
 0x757   :  { %616 = vmatpush.msra.mxu2 %v1842_v15 }
 0x759   :  { %617 = vmatpush.msra.mxu2 %v1843_v16  ;;  %584 = vadd.xlane.f32.xlu0 %v583_v18 }
 0x76d   :  { %627 = vrot.lane.b32.xlu0 %v427_v40, %s2742_s30 }
 0x7bc   :  { %v489_v19 = vpop.xlane.xlu0 %488 }
 0x7bd   :  { %1917 = vrcp.f32 %v489_v19 }
 0x7c3   :  { %v1918_v20 = vpop.eup %1917 }
 0x7c4   :  { %v582_v21 = vpop.xlane.xlu0 %581  ;;  %v493_v22 = vmul.f32 %v1918_v20, %v1912_v35  ;;  %v752_v35 = vld [vmem:[%s2724_s13 + $0x8] sm:$0xff] }
 0x7c5   :  { %1919 = vrcp.f32 %v582_v21 }
 0x7c6   :  { %1730 = vmatmul.msk.f32.gmra.mxu3 %vm279_vm11, %v493_v22 }
 0x7c8   :  { %v523_v23 = vpop.f32.mrf.mxu3 }
 0x7c9   :  { %635 = vrot.lane.b32.xlu2 %v523_v23, %s2746_s25 }
 0x7cb   :  { %v1920_v24 = vpop.eup %1919 }
 0x7cc   :  { %v588_v28 = vmul.f32 %v1920_v24, %v1914_v10  ;;  %v585_v29 = vpop.xlane.xlu0 %584  ;;  %v1869_v24 = vld [vmem:[%s2722_s11] ss:$0 sm:$0xff] }
 0x7cd   :  { %1921 = vrcp.f32 %v585_v29 }
 0x7ce   :  { %1735 = vmatmul.msk.f32.vlgmr.msra.gmra.mxu2 %vm279_vm11, %v588_v28 }
 0x7d1   :  { %629 = vrot.lane.b32.xlu2 %v2340_v42, %s2742_s30 }
 0x7d3   :  { %v1922_v30 = vpop.eup %1921 }
 0x7d4   :  { %v589_v25 = vmul.f32 %v1922_v30, %v1916_v14 }
 0x7d6   :  { %1736 = vmatmul.msk.f32.gmra.mxu2 %vm279_vm11, %v589_v25  ;;  %v1870_v25 = vld [vmem:[%s2723_s12] ss:$0 sm:$0xff] }
 0x7df   :  { %v628_v41 = vpop.permute.xlu0 %627 }
 0x7e0   :  { %v649_v42 = vsel %vm245_vm10, %v2304_v60, %v628_v41  ;;  %v1868_v60 = vld [vmem:[%s2721_s10] ss:$0 sm:$0xff] }
 0x823   :  { %v636_v40 = vpop.permute.xlu2 %635 }
 0x824   :  { %v651_v43 = vsel %vm279_vm11, %v649_v42, %v636_v40  ;;  %v813_v42 = vld [vmem:[%s2726_s15 + $0x38] sm:$0xff] }
 0x825   :  { %833 = vmatpush.msrb.mxu1 %v813_v42 }
 0x82b   :  { %v630_v46 = vpop.permute.xlu2 %629 }
 0x82c   :  { %v650_v48 = vsel %vm245_vm10, %v2306_v61, %v630_v46  ;;  %v809_v46 = vld [vmem:[%s2726_s15 + $0x18] sm:$0xff] }
 0x849   :  { %v526_v32 = vpop.f32.mrf.mxu3 }
 0x84a   :  { %637 = vrot.lane.b32.xlu0 %v526_v32, %s2746_s25 }
 0x851   :  { %v619_v33 = vpop.f32.mrf.mxu2 }
 0x852   :  { %643 = vrot.lane.b32.xlu1 %v619_v33, %s2750_s5 }
 0x859   :  { %v622_v34 = vpop.f32.mrf.mxu2 }
 0x85a   :  { %645 = vrot.lane.b32.xlu1 %v622_v34, %s2750_s5 }
 0x8bc   :  { %v638_v47 = vpop.permute.xlu0 %637 }
 0x8bd   :  { %v652_v49 = vsel %vm279_vm11, %v650_v48, %v638_v47  ;;  %v808_v47 = vld [vmem:[%s2726_s15 + $0x10] sm:$0xff]  ;;  %v807_v48 = vld [vmem:[%s2726_s15 + $0x8] sm:$0xff] }
 0x8c4   :  { %v644_v44 = vpop.permute.xlu1 %643 }
 0x8c5   :  { %v654_v45 = vsel %vm653_vm12, %v651_v43, %v644_v44  ;;  %v812_v43 = vld [vmem:[%s2726_s15 + $0x30] sm:$0xff]  ;;  %v811_v44 = vld [vmem:[%s2726_s15 + $0x28] sm:$0xff] }
 0x8c6   :  { %1737 = vmatmul.msk.f32.vlgmr.msrb.gmra.mxu0 %vm136_vm2, %v654_v45  ;;  %834 = vmatpush.msrb.mxu1 %v812_v43  ;;  %v810_v45 = vld [vmem:[%s2726_s15 + $0x20] sm:$0xff] }
 0x8c8   :  { %835 = vmatpush.msrb.mxu1 %v811_v44 }
 0x8ca   :  { %836 = vmatpush.msrb.mxu1 %v810_v45 }
 0x8cc   :  { %v646_v50 = vpop.permute.xlu1 %645  ;;  %837 = vmatpush.msrb.mxu1 %v809_v46 }
 0x8cd   :  { %v655_v51 = vsel %vm653_vm12, %v652_v49, %v646_v50  ;;  %v806_v49 = vld [vmem:[%s2726_s15] sm:$0xff] }
 0x8ce   :  { %1738 = vmatmul.msk.f32.gmra.mxu0 %vm136_vm2, %v655_v51  ;;  %838 = vmatpush.msrb.mxu1 %v808_v47  ;;  %v1871_v50 = vld [vmem:[%s2725_s14] ss:$0 sm:$0xff] }
 0x8d0   :  { %839 = vmatpush.msrb.mxu1 %v807_v48 }
 0x8d2   :  { %840 = vmatpush.msrb.mxu1 %v806_v49  ;;  %v1873_v49 = vld [vmem:[%s2728_s17] ss:$0 sm:$0xff] }
 0x943   :  { %v687_v52 = vpop.f32.mrf.mxu0 }
 0x944   :  { %v688_v53 = vadd.f32 %v1868_v60, %v687_v52 }
 0x946   :  { %v693_v54 = vadd.f32 %v688_v53, %v2233_v12 }
 0x948   :  { %v697_v55 = vsel %vm136_vm2, %v693_v54, 0.0 }
 0x949   :  { %698 = vadd.xlane.f32.xlu2 %v697_v55 }
 0x94b   :  { %v690_v56 = vpop.f32.mrf.mxu0 }
 0x94c   :  { %v691_v61 = vadd.f32 %v1868_v60, %v690_v56 }
 0x94e   :  { %v694_v57 = vadd.f32 %v691_v61, %v2237_v17  ;;  %v754_v17 = vld [vmem:[%s2724_s13 + $0x18] sm:$0xff] }
 0x94f   :  { %777 = vmatpush.msrb.mxu3 %v754_v17 }
 0x950   :  { %v700_v58 = vsel %vm136_vm2, %v694_v57, 0.0 }
 0x951   :  { %701 = vadd.xlane.f32.xlu0 %v700_v58  ;;  %778 = vmatpush.msrb.mxu3 %v753_v6 }
 0x953   :  { %779 = vmatpush.msrb.mxu3 %v752_v35  ;;  %v1872_v35 = vld [vmem:[%s2727_s16] ss:$0 sm:$0xff] }
 0x955   :  { %780 = vmatpush.msrb.mxu3 %v751_v7 }
 0x9bc   :  { %v699_v59 = vpop.xlane.xlu2 %698 }
 0x9bd   :  { %v703_v62 = vmul.f32 %v699_v59, %v2207_v39 }
 0x9bf   :  { %v705_v63 = vsub.f32 %v693_v54, %v703_v62 }
 0x9c1   :  { %v707_v0 = vmul.f32 %v705_v63, %v705_v63 }
 0x9c3   :  { %v709_v1 = vsel %vm136_vm2, %v707_v0, 0.0 }
 0x9c4   :  { %710 = vadd.xlane.f32.xlu1 %v709_v1  ;;  %v702_v2 = vpop.xlane.xlu0 %701 }
 0x9c5   :  { %v704_v12 = vmul.f32 %v702_v2, %v2207_v39 }
 0x9c7   :  { %v706_v3 = vsub.f32 %v694_v57, %v704_v12 }
 0x9c9   :  { %v708_v4 = vmul.f32 %v706_v3, %v706_v3 }
 0x9cb   :  { %v712_v5 = vsel %vm136_vm2, %v708_v4, 0.0 }
 0x9cc   :  { %713 = vadd.xlane.f32.xlu2 %v712_v5 }
 0xa37   :  { %v711_v8 = vpop.xlane.xlu1 %710 }
 0xa38   :  { %v715_v9 = vmul.f32 %v711_v8, %v2207_v39 }
 0xa3a   :  { %v717_v10 = vadd.f32 1e-12, %v715_v9 }
 0xa3c   :  { %1923 = vrsqrt.f32 %v717_v10  ;;  %vm725_vm14 = vweird.f32 %v717_v10 }
 0xa3f   :  { %v714_v11 = vpop.xlane.xlu2 %713 }
 0xa40   :  { %v716_v13 = vmul.f32 %v714_v11, %v2207_v39 }
 0xa42   :  { %v1924_v14 = vpop.eup %1923  ;;  %v718_v15 = vadd.f32 1e-12, %v716_v13 }
 0xa43   :  { %v720_v16 = vmul.f32 %v1924_v14, %v717_v10  ;;  %vm726_vm13 = vweird.f32 %v1924_v14 }
 0xa44   :  { %1925 = vrsqrt.f32 %v718_v15  ;;  %vm727_vm15 = vmor %vm725_vm14, %vm726_vm13  ;;  %vm735_vm1 = vweird.f32 %v718_v15 }
 0xa45   :  { %v721_v18 = vmul.f32 %v1924_v14, %v720_v16 }
 0xa47   :  { %v722_v19 = vmul.f32 0.5, %v721_v18 }
 0xa49   :  { %v723_v20 = vsub.f32 1.5, %v722_v19 }
 0xa4a   :  { %v1926_v21 = vpop.eup %1925 }
 0xa4b   :  { %v724_v22 = vmul.f32 %v1924_v14, %v723_v20  ;;  %v730_v23 = vmul.f32 %v1926_v21, %v718_v15  ;;  %vm736_vm0 = vweird.f32 %v1926_v21 }
 0xa4c   :  { %vm737_vm3 = vmor %vm735_vm1, %vm736_vm0 }
 0xa4d   :  { %v728_v28 = vsel %vm727_vm15, %v1924_v14, %v724_v22  ;;  %v731_v29 = vmul.f32 %v1926_v21, %v730_v23 }
 0xa4e   :  { %v739_v30 = vmul.f32 %v728_v28, %v705_v63 }
 0xa4f   :  { %v732_v32 = vmul.f32 0.5, %v731_v29 }
 0xa50   :  { %v744_v33 = vmul.f32 %v1869_v24, %v739_v30  ;;  %v1746_v30 = vld [vmem:[%s2767_s0 + $0x38] sm:$0xff] }
 0xa51   :  { %v733_v34 = vsub.f32 1.5, %v732_v32  ;;  %934 = vmatpush.msrb.mxu2 %v1746_v30  ;;  %v1744_v32 = vld [vmem:[%s2767_s0 + $0x28] sm:$0xff] }
 0xa52   :  { %v749_v36 = vadd.f32 %v1870_v25, %v744_v33  ;;  %v1743_v33 = vld [vmem:[%s2767_s0 + $0x20] sm:$0xff] }
 0xa53   :  { %v734_v37 = vmul.f32 %v1926_v21, %v733_v34 }
 0xa54   :  { %1739 = vmatmul.msk.f32.vlgmr.msrb.gmra.mxu3 %vm136_vm2, %v749_v36 }
 0xa55   :  { %v738_v26 = vsel %vm737_vm3, %v1926_v21, %v734_v37 }
 0xa56   :  { %v740_v38 = vmul.f32 %v738_v26, %v706_v3 }
 0xa58   :  { %v745_v40 = vmul.f32 %v1869_v24, %v740_v38 }
 0xa5a   :  { %v750_v41 = vadd.f32 %v1870_v25, %v745_v40  ;;  %v1745_v25 = vld [vmem:[%s2767_s0 + $0x30] sm:$0xff] }
 0xa5b   :  { %935 = vmatpush.msrb.mxu2 %v1745_v25 }
 0xa5c   :  { %1740 = vmatmul.msk.f32.gmra.mxu3 %vm136_vm2, %v750_v41 }
 0xa5d   :  { %936 = vmatpush.msrb.mxu2 %v1744_v32 }
 0xa5f   :  { %937 = vmatpush.msrb.mxu2 %v1743_v33 }
 0xad7   :  { %v782_v51 = vpop.f32.mrf.mxu3 }
 0xad8   :  { %v783_v60 = vadd.f32 %v1871_v50, %v782_v51 }
 0xada   :  { %v790_v52 = vmul.f32 0.044715, %v783_v60  ;;  %v788_v2 = vmul.f32 0.5, %v783_v60 }
 0xadc   :  { %v792_v53 = vmul.f32 %v790_v52, %v783_v60  ;;  %v1874_v52 = vld [vmem:[%s2771_s1] ss:$0 sm:$0xff] }
 0xade   :  { %v794_v54 = vmul.f32 %v792_v53, %v783_v60 }
 0xadf   :  { %v785_v55 = vpop.f32.mrf.mxu3 }
 0xae0   :  { %v796_v56 = vadd.f32 %v794_v54, %v783_v60  ;;  %v786_v61 = vadd.f32 %v1871_v50, %v785_v55 }
 0xae2   :  { %v798_v57 = vmul.f32 0.7978846, %v796_v56  ;;  %v791_v58 = vmul.f32 0.044715, %v786_v61  ;;  %v789_v5 = vmul.f32 0.5, %v786_v61 }
 0xae4   :  { %1927 = vtanh.f32 %v798_v57  ;;  %v793_v59 = vmul.f32 %v791_v58, %v786_v61 }
 0xae6   :  { %v795_v62 = vmul.f32 %v793_v59, %v786_v61 }
 0xae8   :  { %v797_v63 = vadd.f32 %v795_v62, %v786_v61 }
 0xaea   :  { %v1928_v0 = vpop.eup %1927  ;;  %v799_v1 = vmul.f32 0.7978846, %v797_v63  ;;  %v1875_v63 = vld [vmem:[%s2719_s8 + $0x1] ss:$0 sm:$0xff]  ;;  %s2772_s8 = smov 112  }
 0xaeb   :  { %v802_v12 = vadd.f32 1.0, %v1928_v0 }
 0xaec   :  { %1929 = vtanh.f32 %v799_v1 }
 0xaed   :  { %v804_v3 = vmul.f32 %v802_v12, %v788_v2 }
 0xaef   :  { %1741 = vmatmul.msk.f32.vlgmr.msrb.gmra.mxu1 %vm818_vm4, %v804_v3 }
 0xaf2   :  { %v1930_v4 = vpop.eup %1929 }
 0xaf3   :  { %v803_v17 = vadd.f32 1.0, %v1930_v4 }
 0xaf5   :  { %v805_v6 = vmul.f32 %v803_v17, %v789_v5 }
 0xaf7   :  { %1742 = vmatmul.msk.f32.gmra.mxu1 %vm818_vm4, %v805_v6 }
 0xb6c   :  { %v842_v7 = vpop.f32.mrf.mxu1 }
 0xb6d   :  { %v843_v8 = vadd.f32 %v1872_v35, %v842_v7 }
 0xb6f   :  { %v848_v9 = vadd.f32 %v843_v8, %v749_v36 }
 0xb71   :  { %v852_v10 = vsel %vm136_vm2, %v848_v9, 0.0 }
 0xb72   :  { %853 = vadd.xlane.f32.xlu2 %v852_v10 }
 0xb74   :  { %v845_v11 = vpop.f32.mrf.mxu1 }
 0xb75   :  { %v846_v13 = vadd.f32 %v1872_v35, %v845_v11 }
 0xb77   :  { %v849_v14 = vadd.f32 %v846_v13, %v750_v41 }
 0xb79   :  { %v855_v15 = vsel %vm136_vm2, %v849_v14, 0.0 }
 0xb7a   :  { %856 = vadd.xlane.f32.xlu0 %v855_v15 }
 0xbe5   :  { %v854_v16 = vpop.xlane.xlu2 %853 }
 0xbe6   :  { %v858_v18 = vmul.f32 %v854_v16, %v2207_v39 }
 0xbe8   :  { %v860_v19 = vsub.f32 %v848_v9, %v858_v18 }
 0xbea   :  { %v862_v20 = vmul.f32 %v860_v19, %v860_v19 }
 0xbec   :  { %v864_v21 = vsel %vm136_vm2, %v862_v20, 0.0 }
 0xbed   :  { %v857_v22 = vpop.xlane.xlu0 %856  ;;  %865 = vadd.xlane.f32.xlu1 %v864_v21 }
 0xbee   :  { %v859_v23 = vmul.f32 %v857_v22, %v2207_v39 }
 0xbf0   :  { %v861_v24 = vsub.f32 %v849_v14, %v859_v23 }
 0xbf2   :  { %v863_v28 = vmul.f32 %v861_v24, %v861_v24 }
 0xbf4   :  { %v867_v29 = vsel %vm136_vm2, %v863_v28, 0.0 }
 0xbf5   :  { %868 = vadd.xlane.f32.xlu2 %v867_v29 }
 0xc60   :  { %v866_v34 = vpop.xlane.xlu1 %865 }
 0xc61   :  { %v870_v36 = vmul.f32 %v866_v34, %v2207_v39 }
 0xc63   :  { %v872_v37 = vadd.f32 1e-12, %v870_v36 }
 0xc65   :  { %1931 = vrsqrt.f32 %v872_v37  ;;  %vm880_vm6 = vweird.f32 %v872_v37 }
 0xc68   :  { %v869_v26 = vpop.xlane.xlu2 %868 }
 0xc69   :  { %v871_v38 = vmul.f32 %v869_v26, %v2207_v39 }
 0xc6b   :  { %v1932_v40 = vpop.eup %1931  ;;  %v873_v41 = vadd.f32 1e-12, %v871_v38 }
 0xc6c   :  { %v875_v42 = vmul.f32 %v1932_v40, %v872_v37  ;;  %vm881_vm5 = vweird.f32 %v1932_v40 }
 0xc6d   :  { %1933 = vrsqrt.f32 %v873_v41  ;;  %vm882_vm7 = vmor %vm880_vm6, %vm881_vm5  ;;  %vm890_vm9 = vweird.f32 %v873_v41 }
 0xc6e   :  { %v876_v43 = vmul.f32 %v1932_v40, %v875_v42 }
 0xc70   :  { %v877_v44 = vmul.f32 0.5, %v876_v43 }
 0xc72   :  { %v878_v45 = vsub.f32 1.5, %v877_v44 }
 0xc73   :  { %v1934_v46 = vpop.eup %1933 }
 0xc74   :  { %v879_v47 = vmul.f32 %v1932_v40, %v878_v45  ;;  %v885_v48 = vmul.f32 %v1934_v46, %v873_v41  ;;  %vm891_vm8 = vweird.f32 %v1934_v46 }
 0xc75   :  { %vm892_vm13 = vmor %vm890_vm9, %vm891_vm8  ;;  %vm1623_vm8 = vcmask 1040384   ;;  %vm1688_vm9 = vcmask 23552  }
 0xc76   :  { %v883_v50 = vsel %vm882_vm7, %v1932_v40, %v879_v47  ;;  %v886_v51 = vmul.f32 %v1934_v46, %v885_v48 }
 0xc77   :  { %v894_v60 = vmul.f32 %v883_v50, %v860_v19 }
 0xc78   :  { %v887_v53 = vmul.f32 0.5, %v886_v51 }
 0xc79   :  { %v899_v54 = vmul.f32 %v1873_v49, %v894_v60 }
 0xc7a   :  { %v888_v55 = vsub.f32 1.5, %v887_v53 }
 0xc7b   :  { %v2480_v56 = vadd.f32 %v1874_v52, %v899_v54 }
 0xc7c   :  { %v889_v61 = vmul.f32 %v1934_v46, %v888_v55 }
 0xc7d   :  { %1748 = vmatmul.msk.f32.vlgmr.msrb.gmra.mxu2 %vm136_vm2, %v2480_v56 }
 0xc7e   :  { %v893_v57 = vsel %vm892_vm13, %v1934_v46, %v889_v61 }
 0xc7f   :  { %v895_v58 = vmul.f32 %v893_v57, %v861_v24 }
 0xc81   :  { %v900_v59 = vmul.f32 %v1873_v49, %v895_v58 }
 0xc83   :  { %v2484_v62 = vadd.f32 %v1874_v52, %v900_v59 }
 0xc85   :  { %1749 = vmatmul.msk.f32.gmra.mxu2 %vm136_vm2, %v2484_v62 }
 0xd00   :  { %v939_v0 = vpop.f32.mrf.mxu2 }
 0xd01   :  { %v940_v1 = vadd.f32 %v1875_v63, %v939_v0 }
 0xd03   :  { %1047 = vrot.lane.b32.xlu0 %v940_v1, %s2015_s27  ;;  %949 = vrot.lane.b32.xlu2 %v940_v1, %s2010_s3  ;;  %v945_v4 = vmul.f32 0.35355338, %v940_v1 }
 0xd08   :  { %v942_v2 = vpop.f32.mrf.mxu2 }
 0xd09   :  { %v943_v12 = vadd.f32 %v1875_v63, %v942_v2 }
 0xd0b   :  { %1145 = vrot.lane.b32.xlu2 %v943_v12, %s2013_s2  ;;  %1049 = vrot.lane.b32.xlu1 %v943_v12, %s2015_s27  ;;  %v2495_v3 = vpack.i.bf16 %v940_v1, %v943_v12  ;;  %v946_v5 = vmul.f32 0.35355338, %v943_v12  ;;  %s2773_s27 = smov 104  }
 0xd0c   :  { %951 = vrot.lane.b32.xlu0 %v943_v12, %s2010_s3  ;;  %s2774_s3 = smov 56  }
 0xd13   :  { %1239 = vrot.lane.b32.xlu2 %v940_v1, %s2014_s6  ;;  %1043 = vrot.lane.b32.xlu1 %v945_v4, %s2012_s24 }
 0xd14   :  { %1143 = vrot.lane.b32.xlu0 %v940_v1, %s2013_s2  ;;  %s2776_s2 = smov 48  }
 0xd1b   :  { %1241 = vrot.lane.b32.xlu1 %v943_v12, %s2014_s6  ;;  %1141 = vrot.lane.b32.xlu2 %v946_v5, %s2772_s8  ;;  %s2777_s6 = smov 40  }
 0xd1c   :  { %1045 = vrot.lane.b32.xlu0 %v946_v5, %s2012_s24  ;;  %s2775_s24 = smov 64  }
 0xd23   :  { %1139 = vrot.lane.b32.xlu1 %v945_v4, %s2772_s8 }
 0xd24   :  { %1235 = vrot.lane.b32.xlu0 %v945_v4, %s2773_s27 }
 0xd2b   :  { %1237 = vrot.lane.b32.xlu1 %v946_v5, %s2773_s27 }
 0xd5d   :  { %v950_v6 = vpop.permute.xlu2 %949 }
 0xd65   :  { %v1146_v8 = vpop.permute.xlu2 %1145 }
 0xd6d   :  { %v1240_v14 = vpop.permute.xlu2 %1239 }
 0xd75   :  { %v1048_v17 = vpop.permute.xlu0 %1047  ;;  %v1142_v18 = vpop.permute.xlu2 %1141 }
 0xd7d   :  { %v1050_v35 = vpop.permute.xlu1 %1049 }
 0xd7e   :  { %v952_v7 = vpop.permute.xlu0 %951  ;;  %1756 = vmatpush.xpose.msk.msra.mxu1 %vm245_vm10, %v1050_v35 }
 0xd7f   :  { %1750 = vmatpush.xpose.msk.msra.mxu0 %vm245_vm10, %v952_v7 }
 0xd82   :  { %1757 = vmatpush.xpose.msk.msra.mxu1 %vm245_vm10, %v1048_v17 }
 0xd83   :  { %1751 = vmatpush.xpose.msk.msra.mxu0 %vm245_vm10, %v950_v6 }
 0xd85   :  { %v1044_v9 = vpop.permute.xlu1 %1043 }
 0xd86   :  { %v1144_v10 = vpop.permute.xlu0 %1143  ;;  %1752 = vmatmul.msk.f32.vlgmr.msra.gmra.mxu0 %vm245_vm10, %v945_v4  ;;  %1758 = vmatmul.msk.f32.vlgmr.msra.gmra.mxu1 %vm245_vm10, %v1044_v9 }
 0xd87   :  { %1762 = vmatpush.xpose.msk.msrb.mxu0 %vm245_vm10, %v1146_v8 }
 0xd8b   :  { %1763 = vmatpush.xpose.msk.msrb.mxu0 %vm245_vm10, %v1144_v10 }
 0xd8d   :  { %v1242_v11 = vpop.permute.xlu1 %1241 }
 0xd8e   :  { %v1046_v13 = vpop.permute.xlu0 %1045  ;;  %1753 = vmatmul.msk.f32.gmra.mxu0 %vm245_vm10, %v946_v5  ;;  %1768 = vmatpush.xpose.msk.msrb.mxu1 %vm245_vm10, %v1242_v11 }
 0xd8f   :  { %1759 = vmatmul.msk.f32.gmra.mxu1 %vm245_vm10, %v1046_v13 }
 0xd92   :  { %1769 = vmatpush.xpose.msk.msrb.mxu1 %vm245_vm10, %v1240_v14 }
 0xd95   :  { %v1140_v15 = vpop.permute.xlu1 %1139 }
 0xd96   :  { %v1236_v16 = vpop.permute.xlu0 %1235  ;;  %1764 = vmatmul.msk.f32.vlgmr.msrb.gmra.mxu0 %vm245_vm10, %v1140_v15 }
 0xd97   :  { %1770 = vmatmul.msk.f32.vlgmr.msrb.gmra.mxu1 %vm245_vm10, %v1236_v16 }
 0xd9d   :  { %v1238_v19 = vpop.permute.xlu1 %1237 }
 0xd9e   :  { %1765 = vmatmul.msk.f32.gmra.mxu0 %vm245_vm10, %v1142_v18 }
 0xd9f   :  { %1771 = vmatmul.msk.f32.gmra.mxu1 %vm245_vm10, %v1238_v19 }
 0xe03   :  { %v980_v20 = vpop.f32.mrf.mxu0  ;;  %v1076_v21 = vpop.f32.mrf.mxu1 }
 0xe04   :  { %v981_v22 = vadd.f32 %v980_v20, %v2267_v27  ;;  %v1077_v23 = vadd.f32 %v1076_v21, %v2267_v27 }
 0xe06   :  { %v986_v24 = vsel %vm279_vm11, %v981_v22, -inf  ;;  %v1082_v28 = vsel %vm279_vm11, %v1077_v23, -inf }
 0xe07   :  { %987 = vmax.xlane.f32.xlu0 %v986_v24  ;;  %1083 = vmax.xlane.f32.xlu2 %v1082_v28 }
 0xe0b   :  { %v983_v29 = vpop.f32.mrf.mxu0 }
 0xe0c   :  { %v984_v30 = vadd.f32 %v983_v29, %v2274_v31  ;;  %v1079_v25 = vpop.f32.mrf.mxu1 }
 0xe0d   :  { %v1080_v32 = vadd.f32 %v1079_v25, %v2274_v31 }
 0xe0e   :  { %v989_v33 = vsel %vm279_vm11, %v984_v30, -inf }
 0xe0f   :  { %990 = vmax.xlane.f32.xlu1 %v989_v33  ;;  %v1085_v34 = vsel %vm279_vm11, %v1080_v32, -inf }
 0xe10   :  { %1086 = vmax.xlane.f32.xlu0 %v1085_v34 }
 0xe13   :  { %v1172_v36 = vpop.f32.mrf.mxu0 }
 0xe14   :  { %v1173_v37 = vadd.f32 %v1172_v36, %v2267_v27  ;;  %v1268_v26 = vpop.f32.mrf.mxu1 }
 0xe15   :  { %v1269_v38 = vadd.f32 %v1268_v26, %v2267_v27 }
 0xe16   :  { %v1178_v40 = vsel %vm279_vm11, %v1173_v37, -inf }
 0xe17   :  { %1179 = vmax.xlane.f32.xlu2 %v1178_v40  ;;  %v1274_v41 = vsel %vm279_vm11, %v1269_v38, -inf }
 0xe18   :  { %1275 = vmax.xlane.f32.xlu1 %v1274_v41 }
 0xe1b   :  { %v1175_v42 = vpop.f32.mrf.mxu0 }
 0xe1c   :  { %v1176_v43 = vadd.f32 %v1175_v42, %v2274_v31  ;;  %v1271_v44 = vpop.f32.mrf.mxu1 }
 0xe1d   :  { %v1272_v45 = vadd.f32 %v1271_v44, %v2274_v31 }
 0xe1e   :  { %v1181_v46 = vsel %vm279_vm11, %v1176_v43, -inf }
 0xe1f   :  { %v1277_v47 = vsel %vm279_vm11, %v1272_v45, -inf  ;;  %1182 = vmax.xlane.f32.xlu0 %v1181_v46 }
 0xe20   :  { %1278 = vmax.xlane.f32.xlu2 %v1277_v47 }
 0xe33   :  { %1850 = vrot.lane.b32.xlu0 %v2495_v3, %s2774_s3 }
 0xe38   :  { %1845 = vrot.lane.b32.xlu2 %v2495_v3, %s2775_s24 }
 0xe7a   :  { %v988_v27 = vpop.xlane.xlu0 %987  ;;  %v1084_v48 = vpop.xlane.xlu2 %1083 }
 0xe7b   :  { %v992_v49 = vsub.f32 %v981_v22, %v988_v27  ;;  %v1088_v50 = vsub.f32 %v1077_v23, %v1084_v48 }
 0xe7d   :  { %v994_v51 = vmul.f32 1.442695, %v992_v49  ;;  %v1090_v60 = vmul.f32 1.442695, %v1088_v50 }
 0xe7f   :  { %1935 = vpow2.f32 %v994_v51 }
 0xe80   :  { %1937 = vpow2.f32 %v1090_v60 }
 0xe82   :  { %v991_v31 = vpop.xlane.xlu1 %990 }
 0xe83   :  { %v993_v52 = vsub.f32 %v984_v30, %v991_v31  ;;  %v1087_v53 = vpop.xlane.xlu0 %1086 }
 0xe84   :  { %v1089_v61 = vsub.f32 %v1080_v32, %v1087_v53 }
 0xe85   :  { %v2543_v54 = vpop.eup %1935  ;;  %v996_v55 = vmul.f32 1.442695, %v993_v52 }
 0xe86   :  { %v1938_v57 = vpop.eup %1937  ;;  %v998_v58 = vsel %vm279_vm11, %v2543_v54, 0.0  ;;  %v1092_v63 = vmul.f32 1.442695, %v1089_v61 }
 0xe87   :  { %1939 = vpow2.f32 %v996_v55  ;;  %999 = vadd.xlane.f32.xlu1 %v998_v58  ;;  %v1094_v59 = vsel %vm279_vm11, %v1938_v57, 0.0 }
 0xe88   :  { %1095 = vadd.xlane.f32.xlu0 %v1094_v59  ;;  %1941 = vpow2.f32 %v1092_v63 }
 0xe8a   :  { %v1180_v0 = vpop.xlane.xlu2 %1179 }
 0xe8b   :  { %v1276_v1 = vpop.xlane.xlu1 %1275  ;;  %v1184_v4 = vsub.f32 %v1173_v37, %v1180_v0 }
 0xe8c   :  { %v1280_v2 = vsub.f32 %v1269_v38, %v1276_v1 }
 0xe8d   :  { %v1940_v12 = vpop.eup %1939  ;;  %v1186_v6 = vmul.f32 1.442695, %v1184_v4 }
 0xe8e   :  { %v1282_v5 = vmul.f32 1.442695, %v1280_v2  ;;  %v1001_v17 = vsel %vm279_vm11, %v1940_v12, 0.0  ;;  %v1942_v7 = vpop.eup %1941 }
 0xe8f   :  { %1002 = vadd.xlane.f32.xlu1 %v1001_v17  ;;  %v1097_v11 = vsel %vm279_vm11, %v1942_v7, 0.0 }
 0xe90   :  { %1943 = vpow2.f32 %v1282_v5 }
 0xe91   :  { %1945 = vpow2.f32 %v1186_v6  ;;  %v1777_v6 = vld [vmem:[%s2720_s9 + $0x38] sm:$0xff] }
 0xe92   :  { %v1183_v35 = vpop.xlane.xlu0 %1182  ;;  %1389 = vmatpush.msra.mxu0 %v1777_v6 }
 0xe93   :  { %v1279_v8 = vpop.xlane.xlu2 %1278  ;;  %v1185_v9 = vsub.f32 %v1176_v43, %v1183_v35  ;;  %v1776_v35 = vld [vmem:[%s2720_s9 + $0x30] sm:$0xff] }
 0xe94   :  { %v1281_v19 = vsub.f32 %v1272_v45, %v1279_v8  ;;  %1390 = vmatpush.msra.mxu0 %v1776_v35  ;;  %v1774_v8 = vld [vmem:[%s2720_s9 + $0x20] sm:$0xff] }
 0xe95   :  { %v1188_v14 = vmul.f32 1.442695, %v1185_v9 }
 0xe96   :  { %v2549_v10 = vpop.eup %1943  ;;  %v1284_v22 = vmul.f32 1.442695, %v1281_v19 }
 0xe97   :  { %1098 = vadd.xlane.f32.xlu1 %v1097_v11  ;;  %v1286_v13 = vsel %vm279_vm11, %v2549_v10, 0.0  ;;  %v1946_v15 = vpop.eup %1945  ;;  %1947 = vpow2.f32 %v1188_v14 }
 0xe98   :  { %1287 = vadd.xlane.f32.xlu2 %v1286_v13  ;;  %v1190_v21 = vsel %vm279_vm11, %v1946_v15, 0.0  ;;  %1949 = vpow2.f32 %v1284_v22 }
 0xe9b   :  { %v1846_v16 = vpop.permute.xlu2 %1845 }
 0xe9c   :  { %v1847_v18 = vunpack.i.l.bf16 %v1846_v16  ;;  %1855 = vrot.lane.b32.xlu0 %v2495_v3, %s2776_s2  ;;  %v1848_v20 = vunpack.i.h.bf16 %v1846_v16 }
 0xe9d   :  { %v1948_v23 = vpop.eup %1947 }
 0xe9e   :  { %1034 = vmatpush.msra.mxu3 %v1847_v18  ;;  %v1193_v29 = vsel %vm279_vm11, %v1948_v23, 0.0  ;;  %v1950_v25 = vpop.eup %1949 }
 0xe9f   :  { %1191 = vadd.xlane.f32.xlu1 %v1190_v21  ;;  %v1289_v32 = vsel %vm279_vm11, %v1950_v25, 0.0 }
 0xea0   :  { %1035 = vmatpush.msra.mxu3 %v1848_v20 }
 0xea4   :  { %1860 = vrot.lane.b32.xlu0 %v2495_v3, %s2777_s6 }
 0xea5   :  { %v1851_v24 = vpop.permute.xlu0 %1850 }
 0xea6   :  { %v1852_v28 = vunpack.i.l.bf16 %v1851_v24  ;;  %v1853_v30 = vunpack.i.h.bf16 %v1851_v24 }
 0xea7   :  { %1194 = vadd.xlane.f32.xlu1 %v1193_v29 }
 0xea8   :  { %1130 = vmatpush.msra.mxu2 %v1852_v28 }
 0xeaa   :  { %1131 = vmatpush.msra.mxu2 %v1853_v30 }
 0xeaf   :  { %1290 = vadd.xlane.f32.xlu1 %v1289_v32 }
 0xefa   :  { %v1000_v33 = vpop.xlane.xlu1 %999 }
 0xefb   :  { %1951 = vrcp.f32 %v1000_v33  ;;  %v1096_v34 = vpop.xlane.xlu0 %1095 }
 0xefc   :  { %1953 = vrcp.f32 %v1096_v34 }
 0xf01   :  { %v1952_v36 = vpop.eup %1951 }
 0xf02   :  { %v1954_v37 = vpop.eup %1953  ;;  %v1006_v3 = vmul.f32 %v1952_v36, %v2543_v54  ;;  %v1003_v26 = vpop.xlane.xlu1 %1002 }
 0xf03   :  { %v1102_v38 = vmul.f32 %v1954_v37, %v1938_v57  ;;  %1955 = vrcp.f32 %v1003_v26 }
 0xf04   :  { %1754 = vmatmul.msk.f32.vlgmr.msra.gmra.mxu3 %vm279_vm11, %v1006_v3 }
 0xf05   :  { %1760 = vmatmul.msk.f32.vlgmr.msra.gmra.mxu2 %vm279_vm11, %v1102_v38 }
 0xf09   :  { %v1956_v40 = vpop.eup %1955 }
 0xf0a   :  { %v1099_v41 = vpop.xlane.xlu1 %1098  ;;  %v1007_v42 = vmul.f32 %v1956_v40, %v1940_v12 }
 0xf0b   :  { %1957 = vrcp.f32 %v1099_v41  ;;  %v1288_v43 = vpop.xlane.xlu2 %1287 }
 0xf0c   :  { %1755 = vmatmul.msk.f32.gmra.mxu3 %vm279_vm11, %v1007_v42  ;;  %1959 = vrcp.f32 %v1288_v43 }
 0xf0e   :  { %v1856_v44 = vpop.permute.xlu0 %1855 }
 0xf0f   :  { %v1857_v45 = vunpack.i.l.bf16 %v1856_v44  ;;  %v1858_v47 = vunpack.i.h.bf16 %v1856_v44  ;;  %v1785_v44 = vld [vmem:[%s2724_s13 + $0x30] sm:$0xff] }
 0xf11   :  { %v1958_v46 = vpop.eup %1957  ;;  %1226 = vmatpush.msrb.mxu3 %v1857_v45  ;;  %v1784_v45 = vld [vmem:[%s2724_s13 + $0x28] sm:$0xff] }
 0xf12   :  { %v1192_v27 = vpop.xlane.xlu1 %1191  ;;  %v1103_v48 = vmul.f32 %v1958_v46, %v1942_v7  ;;  %v1960_v50 = vpop.eup %1959  ;;  %v1775_v7 = vld [vmem:[%s2720_s9 + $0x28] sm:$0xff]  ;;  %v1783_v46 = vld [vmem:[%s2724_s13 + $0x20] sm:$0xff] }
 0xf13   :  { %1961 = vrcp.f32 %v1192_v27  ;;  %1227 = vmatpush.msrb.mxu3 %v1858_v47  ;;  %v1294_v52 = vmul.f32 %v1960_v50, %v2549_v10  ;;  %1391 = vmatpush.msra.mxu0 %v1775_v7 }
 0xf14   :  { %1761 = vmatmul.msk.f32.gmra.mxu2 %vm279_vm11, %v1103_v48 }
 0xf15   :  { %1392 = vmatpush.msra.mxu0 %v1774_v8 }
 0xf16   :  { %v1861_v49 = vpop.permute.xlu0 %1860 }
 0xf17   :  { %v1862_v51 = vunpack.i.l.bf16 %v1861_v49  ;;  %v1863_v31 = vunpack.i.h.bf16 %v1861_v49 }
 0xf19   :  { %v1962_v60 = vpop.eup %1961  ;;  %1322 = vmatpush.msrb.mxu2 %v1862_v51 }
 0xf1a   :  { %v1198_v53 = vmul.f32 %v1962_v60, %v1946_v15  ;;  %v1195_v54 = vpop.xlane.xlu1 %1194 }
 0xf1b   :  { %1963 = vrcp.f32 %v1195_v54  ;;  %1323 = vmatpush.msrb.mxu2 %v1863_v31 }
 0xf1c   :  { %1766 = vmatmul.msk.f32.vlgmr.msrb.gmra.mxu3 %vm279_vm11, %v1198_v53  ;;  %1772 = vmatmul.msk.f32.vlgmr.msrb.gmra.mxu2 %vm279_vm11, %v1294_v52 }
 0xf21   :  { %v1964_v55 = vpop.eup %1963 }
 0xf22   :  { %v1291_v61 = vpop.xlane.xlu1 %1290  ;;  %v1199_v57 = vmul.f32 %v1964_v55, %v1948_v23  ;;  %v1876_v23 = vld [vmem:[%s2721_s10 + $0x1] ss:$0 sm:$0xff] }
 0xf23   :  { %1965 = vrcp.f32 %v1291_v61  ;;  %v1877_v61 = vld [vmem:[%s2722_s11 + $0x1] ss:$0 sm:$0xff] }
 0xf24   :  { %1767 = vmatmul.msk.f32.gmra.mxu3 %vm279_vm11, %v1199_v57 }
 0xf29   :  { %v1966_v58 = vpop.eup %1965 }
 0xf2a   :  { %v1295_v59 = vmul.f32 %v1966_v58, %v1950_v25 }
 0xf2c   :  { %1773 = vmatmul.msk.f32.gmra.mxu2 %vm279_vm11, %v1295_v59  ;;  %v1878_v59 = vld [vmem:[%s2723_s12 + $0x1] ss:$0 sm:$0xff] }
 0xf87   :  { %v1037_v0 = vpop.f32.mrf.mxu3 }
 0xf88   :  { %v1133_v63 = vpop.f32.mrf.mxu2 }
 0xf89   :  { %1333 = vrot.lane.b32.xlu0 %v1133_v63, %s2778_s29 }
 0xf8f   :  { %v1040_v1 = vpop.f32.mrf.mxu3 }
 0xf97   :  { %v1136_v2 = vpop.f32.mrf.mxu2 }
 0xf98   :  { %1335 = vrot.lane.b32.xlu0 %v1136_v2, %s2778_s29 }
 0xf9f   :  { %v1229_v12 = vpop.f32.mrf.mxu3  ;;  %v1325_v4 = vpop.f32.mrf.mxu2 }
 0xfa0   :  { %1349 = vrot.lane.b32.xlu0 %v1325_v4, %s2779_s18  ;;  %1341 = vrot.lane.b32.xlu1 %v1229_v12, %s2780_s4 }
 0xfa7   :  { %v1232_v5 = vpop.f32.mrf.mxu3 }
 0xfa8   :  { %1343 = vrot.lane.b32.xlu2 %v1232_v5, %s2780_s4 }
 0xfaf   :  { %v1328_v17 = vpop.f32.mrf.mxu2 }
 0xfb0   :  { %1351 = vrot.lane.b32.xlu0 %v1328_v17, %s2779_s18 }
 0xffb   :  { %v1334_v9 = vpop.permute.xlu0 %1333 }
 0xffc   :  { %v1355_v11 = vsel %vm245_vm10, %v1037_v0, %v1334_v9  ;;  %v1797_v9 = vld [vmem:[%s2726_s15 + $0x78] sm:$0xff] }
 0xffd   :  { %1545 = vmatpush.msra.mxu1 %v1797_v9 }
0x1002   :  { %v1344_v19 = vpop.permute.xlu2 %1343 }
0x100a   :  { %v1336_v10 = vpop.permute.xlu0 %1335 }
0x100b   :  { %v1356_v18 = vsel %vm245_vm10, %v1040_v1, %v1336_v10  ;;  %v1796_v10 = vld [vmem:[%s2726_s15 + $0x70] sm:$0xff] }
0x100c   :  { %v1358_v21 = vsel %vm279_vm11, %v1356_v18, %v1344_v19  ;;  %1546 = vmatpush.msra.mxu1 %v1796_v10  ;;  %v1790_v18 = vld [vmem:[%s2726_s15 + $0x40] sm:$0xff] }
0x100d   :  { %v1879_v19 = vld [vmem:[%s2725_s14 + $0x1] ss:$0 sm:$0xff] }
0x1012   :  { %v1350_v13 = vpop.permute.xlu0 %1349  ;;  %v1342_v14 = vpop.permute.xlu1 %1341 }
0x1013   :  { %v1357_v15 = vsel %vm279_vm11, %v1355_v11, %v1342_v14  ;;  %v1795_v11 = vld [vmem:[%s2726_s15 + $0x68] sm:$0xff]  ;;  %v1793_v14 = vld [vmem:[%s2726_s15 + $0x58] sm:$0xff] }
0x1014   :  { %v1359_v16 = vsel %vm653_vm12, %v1357_v15, %v1350_v13  ;;  %1547 = vmatpush.msra.mxu1 %v1795_v11  ;;  %v1794_v13 = vld [vmem:[%s2726_s15 + $0x60] sm:$0xff]  ;;  %v1792_v15 = vld [vmem:[%s2726_s15 + $0x50] sm:$0xff] }
0x1015   :  { %1779 = vmatmul.msk.f32.vlgmr.msra.gmra.mxu0 %vm136_vm2, %v1359_v16  ;;  %v1791_v16 = vld [vmem:[%s2726_s15 + $0x48] sm:$0xff] }
0x1016   :  { %1548 = vmatpush.msra.mxu1 %v1794_v13 }
0x1018   :  { %1549 = vmatpush.msra.mxu1 %v1793_v14 }
0x101a   :  { %1550 = vmatpush.msra.mxu1 %v1792_v15 }
0x101c   :  { %1551 = vmatpush.msra.mxu1 %v1791_v16 }
0x101e   :  { %1552 = vmatpush.msra.mxu1 %v1790_v18 }
0x1022   :  { %v1352_v20 = vpop.permute.xlu0 %1351 }
0x1023   :  { %v1360_v22 = vsel %vm653_vm12, %v1358_v21, %v1352_v20 }
0x1024   :  { %1780 = vmatmul.msk.f32.gmra.mxu0 %vm136_vm2, %v1360_v22 }
0x1092   :  { %v1394_v24 = vpop.f32.mrf.mxu0 }
0x1093   :  { %v1395_v28 = vadd.f32 %v1876_v23, %v1394_v24 }
0x1095   :  { %v1400_v29 = vadd.f32 %v1395_v28, %v2480_v56 }
0x1097   :  { %v1406_v30 = vsel %vm136_vm2, %v1400_v29, 0.0 }
0x1098   :  { %1407 = vadd.xlane.f32.xlu1 %v1406_v30 }
0x10a1   :  { %v1397_v25 = vpop.f32.mrf.mxu0 }
0x10a2   :  { %v1398_v32 = vadd.f32 %v1876_v23, %v1397_v25 }
0x10a4   :  { %v1401_v33 = vadd.f32 %v1398_v32, %v2484_v62  ;;  %v1786_v62 = vld [vmem:[%s2724_s13 + $0x38] sm:$0xff]  ;;  %s2024_s13 = smov [#allocation2]  }
0x10a5   :  { %1488 = vmatpush.msra.mxu3 %v1786_v62  ;;  %v1880_v62 = vld [vmem:[%s2727_s16 + $0x1] ss:$0 sm:$0xff]  ;;  %s1696_s14 = sshll.u32 %s2024_s13, 4  ;;  %s1698_s16 = sshll.u32 %s2734_s23, 4  ;;  %s1697_s14 = int_to_ptr.vmem [resolvable:$true] %s1696_s14  ;;  %s1699_s16 = int_to_ptr.hbm [resolvable:$true] %s1698_s16 }
0x10a6   :  { %v1409_v34 = vsel %vm136_vm2, %v1401_v33, 0.0 }
0x10a7   :  { %1410 = vadd.xlane.f32.xlu0 %v1409_v34  ;;  %1489 = vmatpush.msra.mxu3 %v1785_v44 }
0x10a9   :  { %1490 = vmatpush.msra.mxu3 %v1784_v45 }
0x10ab   :  { %1491 = vmatpush.msra.mxu3 %v1783_v46 }
0x110b   :  { %v1408_v36 = vpop.xlane.xlu1 %1407 }
0x110c   :  { %v1412_v37 = vmul.f32 %v1408_v36, %v2207_v39 }
0x110e   :  { %v1414_v3 = vsub.f32 %v1400_v29, %v1412_v37 }
0x1110   :  { %v1416_v26 = vmul.f32 %v1414_v3, %v1414_v3 }
0x1112   :  { %v1418_v38 = vsel %vm136_vm2, %v1416_v26, 0.0 }
0x1113   :  { %1419 = vadd.xlane.f32.xlu2 %v1418_v38 }
0x111a   :  { %v1411_v40 = vpop.xlane.xlu0 %1410 }
0x111b   :  { %v1413_v56 = vmul.f32 %v1411_v40, %v2207_v39 }
0x111d   :  { %v1415_v41 = vsub.f32 %v1401_v33, %v1413_v56 }
0x111f   :  { %v1417_v42 = vmul.f32 %v1415_v41, %v1415_v41 }
0x1121   :  { %v1421_v43 = vsel %vm136_vm2, %v1417_v42, 0.0 }
0x1122   :  { %1422 = vadd.xlane.f32.xlu1 %v1421_v43 }
0x1186   :  { %v1420_v47 = vpop.xlane.xlu2 %1419 }
0x1187   :  { %v1424_v27 = vmul.f32 %v1420_v47, %v2207_v39 }
0x1189   :  { %v1426_v48 = vadd.f32 1e-12, %v1424_v27 }
0x118b   :  { %1967 = vrsqrt.f32 %v1426_v48  ;;  %vm1434_vm11 = vweird.f32 %v1426_v48 }
0x1191   :  { %v1968_v49 = vpop.eup %1967 }
0x1192   :  { %v1429_v50 = vmul.f32 %v1968_v49, %v1426_v48  ;;  %vm1435_vm10 = vweird.f32 %v1968_v49 }
0x1193   :  { %vm1436_vm12 = vmor %vm1434_vm11, %vm1435_vm10 }
0x1194   :  { %v1430_v51 = vmul.f32 %v1968_v49, %v1429_v50 }
0x1195   :  { %v1423_v60 = vpop.xlane.xlu1 %1422 }
0x1196   :  { %v1431_v31 = vmul.f32 0.5, %v1430_v51  ;;  %v1425_v52 = vmul.f32 %v1423_v60, %v2207_v39 }
0x1198   :  { %v1432_v53 = vsub.f32 1.5, %v1431_v31  ;;  %v1427_v54 = vadd.f32 1e-12, %v1425_v52 }
0x119a   :  { %v1433_v55 = vmul.f32 %v1968_v49, %v1432_v53  ;;  %1969 = vrsqrt.f32 %v1427_v54  ;;  %vm1444_vm15 = vweird.f32 %v1427_v54 }
0x119c   :  { %v1437_v57 = vsel %vm1436_vm12, %v1968_v49, %v1433_v55 }
0x119d   :  { %v1448_v58 = vmul.f32 %v1437_v57, %v1414_v3 }
0x119f   :  { %v1453_v63 = vmul.f32 %v1877_v61, %v1448_v58 }
0x11a0   :  { %v1970_v0 = vpop.eup %1969 }
0x11a1   :  { %v1439_v1 = vmul.f32 %v1970_v0, %v1427_v54  ;;  %v1458_v2 = vadd.f32 %v1878_v59, %v1453_v63  ;;  %vm1445_vm14 = vweird.f32 %v1970_v0 }
0x11a2   :  { %vm1446_vm0 = vmor %vm1444_vm15, %vm1445_vm14 }
0x11a3   :  { %v1440_v12 = vmul.f32 %v1970_v0, %v1439_v1  ;;  %1788 = vmatmul.msk.f32.vlgmr.msra.gmra.mxu3 %vm136_vm2, %v1458_v2  ;;  %v1628_v1 = vld [vmem:[%s2730_s19 + $0x18] sm:$0xff] }
0x11a4   :  { %1648 = vmatpush.msra.mxu2 %v1628_v1 }
0x11a5   :  { %v1441_v4 = vmul.f32 0.5, %v1440_v12  ;;  %v1626_v12 = vld [vmem:[%s2730_s19 + $0x8] sm:$0xff] }
0x11a7   :  { %v1442_v5 = vsub.f32 1.5, %v1441_v4 }
0x11a9   :  { %v1443_v17 = vmul.f32 %v1970_v0, %v1442_v5  ;;  %v1625_v5 = vld [vmem:[%s2730_s19] sm:$0xff] }
0x11ab   :  { %v1447_v6 = vsel %vm1446_vm0, %v1970_v0, %v1443_v17 }
0x11ac   :  { %v1449_v35 = vmul.f32 %v1447_v6, %v1415_v41 }
0x11ae   :  { %v1454_v7 = vmul.f32 %v1877_v61, %v1449_v35 }
0x11b0   :  { %v1459_v8 = vadd.f32 %v1878_v59, %v1454_v7 }
0x11b2   :  { %1789 = vmatmul.msk.f32.gmra.mxu3 %vm136_vm2, %v1459_v8 }
0x1226   :  { %v1493_v20 = vpop.f32.mrf.mxu3 }
0x1227   :  { %v1494_v21 = vadd.f32 %v1879_v19, %v1493_v20 }
0x1229   :  { %v1501_v22 = vmul.f32 0.044715, %v1494_v21  ;;  %v1499_v34 = vmul.f32 0.5, %v1494_v21 }
0x122b   :  { %v1503_v23 = vmul.f32 %v1501_v22, %v1494_v21 }
0x122d   :  { %v1505_v24 = vmul.f32 %v1503_v23, %v1494_v21 }
0x122f   :  { %v1507_v28 = vadd.f32 %v1505_v24, %v1494_v21 }
0x1231   :  { %v1509_v29 = vmul.f32 0.7978846, %v1507_v28 }
0x1233   :  { %1971 = vtanh.f32 %v1509_v29  ;;  %v1882_v29 = vld [vmem:[%s2771_s1 + $0x1] ss:$0 sm:$0xff] }
0x1235   :  { %v1496_v30 = vpop.f32.mrf.mxu3 }
0x1236   :  { %v1497_v25 = vadd.f32 %v1879_v19, %v1496_v30 }
0x1238   :  { %v1502_v32 = vmul.f32 0.044715, %v1497_v25  ;;  %v1500_v41 = vmul.f32 0.5, %v1497_v25 }
0x1239   :  { %v1972_v33 = vpop.eup %1971 }
0x123a   :  { %v1513_v36 = vadd.f32 1.0, %v1972_v33  ;;  %v1504_v37 = vmul.f32 %v1502_v32, %v1497_v25 }
0x123c   :  { %v1515_v3 = vmul.f32 %v1513_v36, %v1499_v34  ;;  %v1506_v26 = vmul.f32 %v1504_v37, %v1497_v25  ;;  %v1660_v34 = vld [vmem:[%s2732_s21 + $0x18] sm:$0xff]  ;;  %v1659_v36 = vld [vmem:[%s2732_s21 + $0x10] sm:$0xff]  ;;  %v1658_v37 = vld [vmem:[%s2732_s21 + $0x8] sm:$0xff] }
0x123d   :  { %1680 = vmatpush.msrb.mxu0 %v1660_v34 }
0x123e   :  { %1799 = vmatmul.msk.f32.vlgmr.msra.gmra.mxu1 %vm818_vm4, %v1515_v3  ;;  %v1508_v38 = vadd.f32 %v1506_v26, %v1497_v25  ;;  %v1657_v3 = vld [vmem:[%s2732_s21] sm:$0xff] }
0x123f   :  { %1681 = vmatpush.msrb.mxu0 %v1659_v36  ;;  %v1883_v26 = vld [vmem:[%s2731_s20] ss:$0 sm:$0xff] }
0x1240   :  { %v1510_v40 = vmul.f32 0.7978846, %v1508_v38 }
0x1241   :  { %1682 = vmatpush.msrb.mxu0 %v1658_v37 }
0x1242   :  { %1973 = vtanh.f32 %v1510_v40 }
0x1243   :  { %1683 = vmatpush.msrb.mxu0 %v1657_v3 }
0x1248   :  { %v1974_v56 = vpop.eup %1973 }
0x1249   :  { %v1514_v42 = vadd.f32 1.0, %v1974_v56 }
0x124b   :  { %v1516_v43 = vmul.f32 %v1514_v42, %v1500_v41  ;;  %v1884_v41 = vld [vmem:[%s2733_s22] ss:$0 sm:$0xff] }
0x124d   :  { %1800 = vmatmul.msk.f32.gmra.mxu1 %vm818_vm4, %v1516_v43 }
0x12bb   :  { %v1554_v44 = vpop.f32.mrf.mxu1 }
0x12bc   :  { %v1555_v45 = vadd.f32 %v1880_v62, %v1554_v44 }
0x12be   :  { %v1560_v46 = vadd.f32 %v1555_v45, %v1458_v2  ;;  %v1627_v2 = vld [vmem:[%s2730_s19 + $0x10] sm:$0xff] }
0x12bf   :  { %1649 = vmatpush.msra.mxu2 %v1627_v2 }
0x12c0   :  { %v1566_v47 = vsel %vm136_vm2, %v1560_v46, 0.0 }
0x12c1   :  { %1567 = vadd.xlane.f32.xlu1 %v1566_v47  ;;  %1650 = vmatpush.msra.mxu2 %v1626_v12 }
0x12c3   :  { %1651 = vmatpush.msra.mxu2 %v1625_v5 }
0x12ca   :  { %v1557_v27 = vpop.f32.mrf.mxu1 }
0x12cb   :  { %v1558_v48 = vadd.f32 %v1880_v62, %v1557_v27 }
0x12cd   :  { %v1561_v49 = vadd.f32 %v1558_v48, %v1459_v8 }
0x12cf   :  { %v1569_v50 = vsel %vm136_vm2, %v1561_v49, 0.0 }
0x12d0   :  { %1570 = vadd.xlane.f32.xlu0 %v1569_v50 }
0x1334   :  { %v1568_v51 = vpop.xlane.xlu1 %1567 }
0x1335   :  { %v1572_v60 = vmul.f32 %v1568_v51, %v2207_v39 }
0x1337   :  { %v1574_v31 = vsub.f32 %v1560_v46, %v1572_v60 }
0x1339   :  { %v1576_v52 = vmul.f32 %v1574_v31, %v1574_v31 }
0x133b   :  { %v1578_v53 = vsel %vm136_vm2, %v1576_v52, 0.0 }
0x133c   :  { %1579 = vadd.xlane.f32.xlu1 %v1578_v53 }
0x1343   :  { %v1571_v54 = vpop.xlane.xlu0 %1570 }
0x1344   :  { %v1573_v55 = vmul.f32 %v1571_v54, %v2207_v39 }
0x1346   :  { %v1575_v61 = vsub.f32 %v1561_v49, %v1573_v55 }
0x1348   :  { %v1577_v57 = vmul.f32 %v1575_v61, %v1575_v61 }
0x134a   :  { %v1581_v58 = vsel %vm136_vm2, %v1577_v57, 0.0 }
0x134b   :  { %1582 = vadd.xlane.f32.xlu0 %v1581_v58 }
0x13af   :  { %v1580_v59 = vpop.xlane.xlu1 %1579 }
0x13b0   :  { %v1584_v63 = vmul.f32 %v1580_v59, %v2207_v39 }
0x13b2   :  { %v1586_v0 = vadd.f32 1e-12, %v1584_v63 }
0x13b4   :  { %1975 = vrsqrt.f32 %v1586_v0  ;;  %vm1594_vm3 = vweird.f32 %v1586_v0 }
0x13ba   :  { %v1976_v4 = vpop.eup %1975 }
0x13bb   :  { %v1589_v17 = vmul.f32 %v1976_v4, %v1586_v0  ;;  %vm1595_vm1 = vweird.f32 %v1976_v4 }
0x13bc   :  { %vm1596_vm4 = vmor %vm1594_vm3, %vm1595_vm1 }
0x13bd   :  { %v1590_v7 = vmul.f32 %v1976_v4, %v1589_v17 }
0x13be   :  { %v1583_v6 = vpop.xlane.xlu0 %1582 }
0x13bf   :  { %v1585_v35 = vmul.f32 %v1583_v6, %v2207_v39  ;;  %v1591_v9 = vmul.f32 0.5, %v1590_v7  ;;  %v1881_v39 = vld [vmem:[%s2728_s17 + $0x1] ss:$0 sm:$0xff] }
0x13c1   :  { %v1587_v8 = vadd.f32 1e-12, %v1585_v35  ;;  %v1592_v10 = vsub.f32 1.5, %v1591_v9 }
0x13c3   :  { %1977 = vrsqrt.f32 %v1587_v8  ;;  %v1593_v14 = vmul.f32 %v1976_v4, %v1592_v10  ;;  %vm1604_vm6 = vweird.f32 %v1587_v8 }
0x13c5   :  { %v1597_v18 = vsel %vm1596_vm4, %v1976_v4, %v1593_v14 }
0x13c6   :  { %v1608_v21 = vmul.f32 %v1597_v18, %v1574_v31 }
0x13c8   :  { %v1613_v24 = vmul.f32 %v1881_v39, %v1608_v21 }
0x13c9   :  { %v1978_v11 = vpop.eup %1977 }
0x13ca   :  { %v1599_v13 = vmul.f32 %v1978_v11, %v1587_v8  ;;  %vm1605_vm5 = vweird.f32 %v1978_v11  ;;  %v1618_v25 = vadd.f32 %v1882_v29, %v1613_v24 }
0x13cb   :  { %vm1606_vm7 = vmor %vm1604_vm6, %vm1605_vm5 }
0x13cc   :  { %v1600_v15 = vmul.f32 %v1978_v11, %v1599_v13 }
0x13ce   :  { %v1601_v16 = vmul.f32 0.5, %v1600_v15 }
0x13d0   :  { %v1602_v19 = vsub.f32 1.5, %v1601_v16 }
0x13d2   :  { %v1603_v20 = vmul.f32 %v1978_v11, %v1602_v19 }
0x13d4   :  { %v1607_v22 = vsel %vm1606_vm7, %v1978_v11, %v1603_v20 }
0x13d5   :  { %v1609_v23 = vmul.f32 %v1607_v22, %v1575_v61 }
0x13d7   :  { %v1614_v28 = vmul.f32 %v1881_v39, %v1609_v23 }
0x13d9   :  { %v1619_v30 = vadd.f32 %v1882_v29, %v1614_v28 }
0x13db   :  { %v1621_v32 = vrot.slane %v1619_v30, 7 }
0x13dd   :  { %v1624_v33 = vsel %vm1623_vm8, %v1618_v25, %v1621_v32 }
0x13de   :  { %1803 = vmatmul.msk.f32.vlgmr.msra.gmra.mxu2 %vm136_vm2, %v1624_v33 }
0x1461   :  { %v1653_v38 = vpop.f32.mrf.mxu2 }
0x1462   :  { %v1654_v40 = vadd.f32 %v1883_v26, %v1653_v38 }
0x1464   :  { %1979 = vtanh.f32 %v1654_v40 }
0x146a   :  { %v1980_v56 = vpop.eup %1979 }
0x146b   :  { %1804 = vmatmul.msk.f32.vlgmr.msrb.gmra.mxu0 %vm136_vm2, %v1980_v56 }
0x14e8   :  { %v1685_v42 = vpop.f32.mrf.mxu0 }
0x14e9   :  { %v1686_v43 = vadd.f32 %v1884_v41, %v1685_v42 }
0x14eb   :  { %v1689_v62 = vsel %vm1688_vm9, %v1686_v43, 0.0 }
0x14ec   :  { %1690 = vst [vmem:[#allocation2] sm:$0x3] %v1689_v62 }
0x14ed   :  { %1701 = dma.vmem_to_hbm [thread:$0]  %s1697_s14, 32, %s1699_s16, [#allocation3]  }
0x14ee   :  { %2005 = dma.done.wait [#allocation3], 32  }
0x14ef   :  { %2006 = vsyncadd [#allocation3], 4294967264 }
0x14f0   :  { %1706 = vsyncpa [#allocation3], 1 }

</bundles_post_ra>
